<compile_context>
chip_gen: v5e
topology: v5e:2x2
jax: 0.10.0
libtpu: 0.0.40
codegen_flags: <defaults>
</compile_context>

<pallas_src>
import jax
import jax.numpy as jnp
from jax import lax
from jax.experimental import pallas as pl
from jax.experimental.pallas import tpu as pltpu


# ------------------------------ configuration ------------------------------
BASE_CH = 8
OUT_CH = 1
LATENT = 8
OUTPUT_SIZE = 16
K = 3                       # kernel_sizes = [3, 3]
SCALING_STEPS = 1
CONV_STEPS = 1
BLOCK_LAYERS = 1
SCALE_LAYERS = BLOCK_LAYERS * SCALING_STEPS          # 1
INIT_SIZE = OUTPUT_SIZE // (2 ** SCALE_LAYERS)       # 8
INIT_CH = (2 ** SCALE_LAYERS) * BASE_CH              # 16
LEAKY_SLOPE = 0.01
BN_EPS = 1e-5

# In-kernel activation layout: (channels, flattened zero-padded 18x18 map).
HP = OUTPUT_SIZE + 2        # 18 padded height
WP = OUTPUT_SIZE + 2        # 18 padded width (row pitch)
NPIX = HP * WP              # 324 pixels of the padded map
XW = 384                    # lane-padded scratch width (>= 2*WP+2 + 16*WP, mult of 128)
LW = OUTPUT_SIZE * WP       # 288: one conv-tap slab / one layer-output slab
ZW = INIT_CH * LATENT       # 128: block-diagonal latent width


# ------------------------------ fused Pallas kernel ------------------------------
def _decoder_kernel(zexp_ref, w1blk_ref, b1_ref,
                    w1_ref, s1_ref, t1_ref,
                    w2_ref, s2_ref, t2_ref,
                    wf_ref, out_ref,
                    x1_s, x2_s, x3_s):
    """Whole decoder for one batch image per grid step.

    Activations live in VMEM as (channels, flattened zero-padded 18x18 map) with
    the spatial axis on lanes.  Each 3x3 conv is 9 accumulating
    (Cout, Cin) @ (Cin, 16*18) bf16 matmuls (one per tap, whole image at once);
    BatchNorm is pre-folded into per-channel scale/shift.
    """

    def conv3x3(x_ref, w_ref, cout):
        acc = jnp.zeros((cout, LW), jnp.float32)
        for kh in range(K):                      # static 9-tap unroll
            for kw in range(K):
                xs = x_ref[:, pl.ds(kh * WP + kw, LW)].astype(jnp.bfloat16)
                acc = acc + jnp.dot(w_ref[kh * K + kw], xs,
                                    preferred_element_type=jnp.float32)
        return acc

    # Junk-column mask (hoisted, shared by both intermediate layers): zero the
    # 2 over-read columns per image row before embedding into the padded map.
    col_ok = (lax.broadcasted_iota(jnp.int32, (BASE_CH, LW), 1) % WP) < OUTPUT_SIZE

    def store_padded(dst_ref, y):
        # Embed the valid 16x16 map into the zero-padded 18x18 scratch so the
        # next conv can consume it with plain shifted slab reads.
        y = jnp.where(col_ok, y, 0.0)
        dst_ref[...] = jnp.zeros_like(dst_ref)
        dst_ref[:, pl.ds(WP + 1, LW)] = y

    # -- MLPBlock (single Linear) fused with the ConvTranspose2d input dilation
    #    (the zero-insert/pad scatter is folded into the fc weight host-side):
    #    one (16,128)@(128,384) matmul yields the dilated padded map directly.
    x1_s[...] = jnp.dot(zexp_ref[0], w1blk_ref[...],
                        preferred_element_type=jnp.float32) + b1_ref[...]

    # -- ConvBlock 1: ConvTranspose2d(16->8,k3,s2,p1,op1) + BN + LeakyReLU
    y1 = conv3x3(x1_s, w1_ref, BASE_CH) * s1_ref[...] + t1_ref[...]
    y1 = jnp.where(y1 >= 0.0, y1, LEAKY_SLOPE * y1)
    store_padded(x2_s, y1)

    # -- ConvBlock 2: Conv2d(8->8,k3,'same') + BN + LeakyReLU
    y2 = conv3x3(x2_s, w2_ref, BASE_CH) * s2_ref[...] + t2_ref[...]
    y2 = jnp.where(y2 >= 0.0, y2, LEAKY_SLOPE * y2)
    store_padded(x3_s, y2)

    # -- final Conv2d(8->1,k3,p1) + Sigmoid (junk columns stripped by wrapper)
    out_ref[0] = jax.nn.sigmoid(conv3x3(x3_s, wf_ref, OUT_CH))


# ------------------------------ host-side weight plumbing ------------------------------
def bn_fold(gamma, beta, mean, var, eps=BN_EPS):
    s = gamma / jnp.sqrt(var + eps)
    return s, beta - mean * s


def _prep_params(p):
    """Re-index PyTorch-layout weights into the kernel's channel-major layout.

    Pure weight transforms (no activation math happens here)."""
    f32, bf16 = jnp.float32, jnp.bfloat16

    # fc weight/bias with the transposed-conv input dilation + padding folded in:
    # fc output (channel c, pixel (h, w)) lands at padded position (1+2h, 1+2w).
    w = p["fc_w"].reshape(LATENT, INIT_CH, INIT_SIZE, INIT_SIZE)
    wd = jnp.zeros((LATENT, INIT_CH, HP, WP), f32)
    wd = wd.at[:, :, 1:HP - 1:2, 1:WP - 1:2].set(w)
    w1blk = jnp.transpose(wd, (1, 0, 2, 3)).reshape(ZW, NPIX)         # row = c*LATENT + k
    w1blk = jnp.pad(w1blk, ((0, 0), (0, XW - NPIX))).astype(bf16)     # (128, 384)

    b = p["fc_b"].reshape(INIT_CH, INIT_SIZE, INIT_SIZE)
    bd = jnp.zeros((INIT_CH, HP, WP), f32).at[:, 1:HP - 1:2, 1:WP - 1:2].set(b)
    b1 = jnp.pad(bd.reshape(INIT_CH, NPIX), ((0, 0), (0, XW - NPIX)))  # (16, 384) f32

    # ConvTranspose2d weight (Cin,Cout,K,K) -> per-tap (Cout,Cin), spatially flipped
    # (stride-2 transpose conv == stride-1 conv over the dilated/padded map).
    w1 = jnp.transpose(p["wT"][:, :, ::-1, ::-1], (2, 3, 1, 0))
    w1 = w1.reshape(K * K, BASE_CH, INIT_CH).astype(bf16)
    # Conv2d weights (Cout,Cin,K,K) -> per-tap (Cout,Cin).
    w2 = jnp.transpose(p["w2"], (2, 3, 0, 1)).reshape(K * K, BASE_CH, BASE_CH).astype(bf16)
    wf = jnp.transpose(p["wf"], (2, 3, 0, 1)).reshape(K * K, OUT_CH, BASE_CH).astype(bf16)

    s1, t1 = bn_fold(p["bn1_gamma"], p["bn1_beta"], p["bn1_mean"], p["bn1_var"])
    s2, t2 = bn_fold(p["bn2_gamma"], p["bn2_beta"], p["bn2_mean"], p["bn2_var"])
    return dict(w1blk=w1blk, b1=b1, w1=w1,
                s1=s1.reshape(BASE_CH, 1), t1=t1.reshape(BASE_CH, 1),
                w2=w2, s2=s2.reshape(BASE_CH, 1), t2=t2.reshape(BASE_CH, 1),
                wf=wf)


def decoder_forward(z, p):
    B = z.shape[0]
    kp = _prep_params(p)

    # Layout plumbing: block-diagonal expansion of z so the in-kernel fc matmul
    # lands directly in channel-major form:  zexp[b, c, c*LATENT + k] = z[b, k].
    idx = jnp.arange(ZW)
    zexp = jnp.where((idx[None, :] // LATENT) == jnp.arange(INIT_CH)[:, None],
                     z[:, None, idx % LATENT], 0.0).astype(jnp.bfloat16)   # (B, 16, 128)

    out = pl.pallas_call(
        _decoder_kernel,
        out_shape=jax.ShapeDtypeStruct((B, 1, LW), jnp.float32),
        grid=(B,),
        in_specs=[
            pl.BlockSpec((1, INIT_CH, ZW), lambda b: (b, 0, 0)),        # zexp
            pl.BlockSpec((ZW, XW), lambda b: (0, 0)),                   # fc weight (scattered)
            pl.BlockSpec((INIT_CH, XW), lambda b: (0, 0)),              # fc bias  (scattered)
            pl.BlockSpec((K * K, BASE_CH, INIT_CH), lambda b: (0, 0, 0)),  # convT taps
            pl.BlockSpec((BASE_CH, 1), lambda b: (0, 0)),               # bn1 scale
            pl.BlockSpec((BASE_CH, 1), lambda b: (0, 0)),               # bn1 shift
            pl.BlockSpec((K * K, BASE_CH, BASE_CH), lambda b: (0, 0, 0)),  # conv2 taps
            pl.BlockSpec((BASE_CH, 1), lambda b: (0, 0)),               # bn2 scale
            pl.BlockSpec((BASE_CH, 1), lambda b: (0, 0)),               # bn2 shift
            pl.BlockSpec((K * K, OUT_CH, BASE_CH), lambda b: (0, 0, 0)),   # final conv taps
        ],
        out_specs=pl.BlockSpec((1, 1, LW), lambda b: (b, 0, 0)),
        scratch_shapes=[
            pltpu.VMEM((INIT_CH, XW), jnp.float32),    # dilated/padded fc map
            pltpu.VMEM((BASE_CH, XW), jnp.float32),    # padded conv1 output
            pltpu.VMEM((BASE_CH, XW), jnp.float32),    # padded conv2 output
        ],
        compiler_params=pltpu.CompilerParams(dimension_semantics=("parallel",)),
    )(zexp, kp["w1blk"], kp["b1"], kp["w1"], kp["s1"], kp["t1"],
      kp["w2"], kp["s2"], kp["t2"], kp["wf"])

    # Strip the 2 junk columns per image row and restore NCHW.
    out = out.reshape(B, OUTPUT_SIZE, WP)[:, :, :OUTPUT_SIZE]
    return out.reshape(B, OUT_CH, OUTPUT_SIZE, OUTPUT_SIZE)


# ------------------------------ pure-JAX reference (for self-check) ------------------------------
def decoder_reference(z, p):
    B = z.shape[0]
    h = z @ p["fc_w"] + p["fc_b"]
    x = h.reshape(B, INIT_CH, INIT_SIZE, INIT_SIZE)
    dn = ("NCHW", "OIHW", "NCHW")

    # ConvTranspose2d(16->8,k3,s2,p1,op1) == lhs-dilated conv with flipped kernel.
    w1 = jnp.transpose(p["wT"][:, :, ::-1, ::-1], (1, 0, 2, 3))
    x = lax.conv_general_dilated(x, w1, (1, 1), [(1, 2), (1, 2)],
                                 lhs_dilation=(2, 2), dimension_numbers=dn)
    s1, t1 = bn_fold(p["bn1_gamma"], p["bn1_beta"], p["bn1_mean"], p["bn1_var"])
    x = x * s1[None, :, None, None] + t1[None, :, None, None]
    x = jnp.where(x >= 0, x, LEAKY_SLOPE * x)

    x = lax.conv_general_dilated(x, p["w2"], (1, 1), [(1, 1), (1, 1)],
                                 dimension_numbers=dn)
    s2, t2 = bn_fold(p["bn2_gamma"], p["bn2_beta"], p["bn2_mean"], p["bn2_var"])
    x = x * s2[None, :, None, None] + t2[None, :, None, None]
    x = jnp.where(x >= 0, x, LEAKY_SLOPE * x)

    x = lax.conv_general_dilated(x, p["wf"], (1, 1), [(1, 1), (1, 1)],
                                 dimension_numbers=dn)
    return jax.nn.sigmoid(x)


# ------------------------------ params ------------------------------
def init_params(key):
    ks = jax.random.split(key, 16)
    p = {}
    fc_out = INIT_CH * INIT_SIZE * INIT_SIZE
    p["fc_w"] = 0.05 * jax.random.normal(ks[0], (LATENT, fc_out), jnp.float32)
    p["fc_b"] = 0.05 * jax.random.normal(ks[1], (fc_out,), jnp.float32)
    # ConvTranspose2d(INIT_CH, BASE_CH, K, stride=2, padding=(K-1)//2, output_padding=1)
    p["wT"] = 0.1 * jax.random.normal(ks[2], (INIT_CH, BASE_CH, K, K), jnp.float32)
    p["bn1_gamma"] = 1.0 + 0.1 * jax.random.normal(ks[3], (BASE_CH,), jnp.float32)
    p["bn1_beta"] = 0.1 * jax.random.normal(ks[4], (BASE_CH,), jnp.float32)
    p["bn1_mean"] = 0.1 * jax.random.normal(ks[5], (BASE_CH,), jnp.float32)
    p["bn1_var"] = 1.0 + 0.1 * jnp.abs(jax.random.normal(ks[6], (BASE_CH,), jnp.float32))
    # Conv2d(BASE_CH, BASE_CH, K, stride=1, padding='same')
    p["w2"] = 0.1 * jax.random.normal(ks[7], (BASE_CH, BASE_CH, K, K), jnp.float32)
    p["bn2_gamma"] = 1.0 + 0.1 * jax.random.normal(ks[8], (BASE_CH,), jnp.float32)
    p["bn2_beta"] = 0.1 * jax.random.normal(ks[9], (BASE_CH,), jnp.float32)
    p["bn2_mean"] = 0.1 * jax.random.normal(ks[10], (BASE_CH,), jnp.float32)
    p["bn2_var"] = 1.0 + 0.1 * jnp.abs(jax.random.normal(ks[11], (BASE_CH,), jnp.float32))
    # Final Conv2d(BASE_CH, OUT_CH, K, stride=1, padding=(K+1)//2-1)
    p["wf"] = 0.1 * jax.random.normal(ks[12], (OUT_CH, BASE_CH, K, K), jnp.float32)
    return p


if __name__ == "__main__":
    key = jax.random.PRNGKey(0)
    k_in, k_par = jax.random.split(key)
    z = jax.random.normal(k_in, (2, LATENT), jnp.float32)
    params = init_params(k_par)

    out = jax.jit(decoder_forward)(z, params)
    out = jax.block_until_ready(out)

    assert out.shape == (2, OUT_CH, OUTPUT_SIZE, OUTPUT_SIZE), out.shape
    assert bool(jnp.all(jnp.isfinite(out)))
    assert bool(jnp.all((out >= 0.0) & (out <= 1.0)))            # sigmoid output

    ref = decoder_reference(z, params)
    max_err = float(jnp.max(jnp.abs(out - ref)))
    assert max_err < 3e-2, max_err                               # bf16 matmuls, f32 accum
    print("KERNEL_OK")
</pallas_src>

<mosaic_0001>
module attributes {stable_mosaic.version = 11 : i64} {
  func.func @_decoder_kernel(%arg0: i32, %arg1: memref<1x16x128xbf16, #tpu.memory_space<vmem>>, %arg2: memref<128x384xbf16, #tpu.memory_space<vmem>>, %arg3: memref<16x384xf32, #tpu.memory_space<vmem>>, %arg4: memref<9x8x16xbf16, #tpu.memory_space<vmem>>, %arg5: memref<8x1xf32, #tpu.memory_space<vmem>>, %arg6: memref<8x1xf32, #tpu.memory_space<vmem>>, %arg7: memref<9x8x8xbf16, #tpu.memory_space<vmem>>, %arg8: memref<8x1xf32, #tpu.memory_space<vmem>>, %arg9: memref<8x1xf32, #tpu.memory_space<vmem>>, %arg10: memref<9x1x8xbf16, #tpu.memory_space<vmem>>, %arg11: memref<1x1x288xf32, #tpu.memory_space<vmem>>, %arg12: memref<16x384xf32, #tpu.memory_space<vmem>>, %arg13: memref<8x384xf32, #tpu.memory_space<vmem>>, %arg14: memref<8x384xf32, #tpu.memory_space<vmem>>) attributes {dimension_semantics = [#tpu.dimension_semantics<parallel>], iteration_bounds = array<i64: 2>, scalar_prefetch = 0 : i64, scratch_operands = 3 : i64, tpu.core_type = #tpu.core_type<tc>, window_params = [{transform_indices = @transform_0, window_bounds = array<i64: 1, 16, 128>}, {pipeline_mode = #tpu.pipeline_mode<synchronous>, transform_indices = @transform_1, window_bounds = array<i64: 128, 384>}, {pipeline_mode = #tpu.pipeline_mode<synchronous>, transform_indices = @transform_2, window_bounds = array<i64: 16, 384>}, {pipeline_mode = #tpu.pipeline_mode<synchronous>, transform_indices = @transform_3, window_bounds = array<i64: 9, 8, 16>}, {pipeline_mode = #tpu.pipeline_mode<synchronous>, transform_indices = @transform_4, window_bounds = array<i64: 8, 1>}, {pipeline_mode = #tpu.pipeline_mode<synchronous>, transform_indices = @transform_5, window_bounds = array<i64: 8, 1>}, {pipeline_mode = #tpu.pipeline_mode<synchronous>, transform_indices = @transform_6, window_bounds = array<i64: 9, 8, 8>}, {pipeline_mode = #tpu.pipeline_mode<synchronous>, transform_indices = @transform_7, window_bounds = array<i64: 8, 1>}, {pipeline_mode = #tpu.pipeline_mode<synchronous>, transform_indices = @transform_8, window_bounds = array<i64: 8, 1>}, {pipeline_mode = #tpu.pipeline_mode<synchronous>, transform_indices = @transform_9, window_bounds = array<i64: 9, 1, 8>}, {transform_indices = @transform_10, window_bounds = array<i64: 1, 1, 288>}]} {
    %0 = tpu.iota {dimensions = array<i32: 1>} : vector<8x288xi32>
    %c18_i32 = arith.constant 18 : i32
    %c0_i32 = arith.constant 0 : i32
    %1 = arith.cmpi eq, %c18_i32, %c0_i32 : i32
    %c1_i32 = arith.constant 1 : i32
    %2 = arith.select %1, %c1_i32, %c18_i32 : i32
    %3 = vector.broadcast %2 : i32 to vector<8x288xi32>
    %4 = arith.remsi %0, %3 : vector<8x288xi32>
    %c0_i32_0 = arith.constant 0 : i32
    %5 = vector.broadcast %c0_i32_0 : i32 to vector<8x288xi32>
    %6 = arith.cmpi ne, %4, %5 : vector<8x288xi32>
    %c0_i32_1 = arith.constant 0 : i32
    %7 = vector.broadcast %c0_i32_1 : i32 to vector<8x288xi32>
    %8 = arith.cmpi slt, %4, %7 : vector<8x288xi32>
    %c0_i32_2 = arith.constant 0 : i32
    %9 = arith.cmpi slt, %2, %c0_i32_2 : i32
    %10 = vector.broadcast %9 : i1 to vector<8x288xi1>
    %11 = vector.broadcast %10 : vector<8x288xi1> to vector<8x288xi1>
    %12 = arith.xori %8, %11 : vector<8x288xi1>
    %13 = arith.andi %12, %6 : vector<8x288xi1>
    %14 = vector.broadcast %2 : i32 to vector<8x288xi32>
    %15 = arith.addi %4, %14 : vector<8x288xi32>
    %16 = arith.select %13, %15, %4 : vector<8x288xi1>, vector<8x288xi32>
    %c16_i32 = arith.constant 16 : i32
    %17 = vector.broadcast %c16_i32 : i32 to vector<8x288xi32>
    %18 = arith.cmpi slt, %16, %17 : vector<8x288xi32>
    %c0 = arith.constant 0 : index
    %c0_3 = arith.constant 0 : index
    %c0_4 = arith.constant 0 : index
    %19 = vector.load %arg1[%c0, %c0_3, %c0_4] : memref<1x16x128xbf16, #tpu.memory_space<vmem>>, vector<1x16x128xbf16>
    %20 = vector.shape_cast %19 : vector<1x16x128xbf16> to vector<16x128xbf16>
    %c0_5 = arith.constant 0 : index
    %c0_6 = arith.constant 0 : index
    %21 = vector.load %arg2[%c0_5, %c0_6] : memref<128x384xbf16, #tpu.memory_space<vmem>>, vector<128x384xbf16>
    %cst = arith.constant dense<0.000000e+00> : vector<16x384xf32>
    %22 = tpu.matmul %20, %21, %cst {dimension_numbers = #tpu.dot_dimension_numbers<[1], [0], [0], [1], [0, 0, 1, 1], [], []>} : vector<16x128xbf16>, vector<128x384xbf16>, vector<16x384xf32> -> vector<16x384xf32>
    %c0_7 = arith.constant 0 : index
    %c0_8 = arith.constant 0 : index
    %23 = vector.load %arg3[%c0_7, %c0_8] : memref<16x384xf32, #tpu.memory_space<vmem>>, vector<16x384xf32>
    %24 = arith.addf %22, %23 : vector<16x384xf32>
    %c0_9 = arith.constant 0 : index
    %c0_10 = arith.constant 0 : index
    %25 = vector.load %arg12[%c0_9, %c0_10] : memref<16x384xf32, #tpu.memory_space<vmem>>, vector<16x384xf32>
    tpu.vector_store %arg12[%c0_9, %c0_10], %24 {strides = array<i32>} : memref<16x384xf32, #tpu.memory_space<vmem>>, vector<16x384xf32>,
    %cst_11 = arith.constant 0.000000e+00 : f32
    %26 = vector.broadcast %cst_11 : f32 to vector<8x288xf32>
    %c0_12 = arith.constant 0 : index
    %c0_13 = arith.constant 0 : index
    %27 = vector.load %arg12[%c0_12, %c0_13] : memref<16x384xf32, #tpu.memory_space<vmem>>, vector<16x288xf32>
    %28 = arith.truncf %27 : vector<16x288xf32> to vector<16x288xbf16>
    %c0_14 = arith.constant 0 : index
    %c0_15 = arith.constant 0 : index
    %c0_16 = arith.constant 0 : index
    %29 = vector.load %arg4[%c0_14, %c0_15, %c0_16] : memref<9x8x16xbf16, #tpu.memory_space<vmem>>, vector<1x8x16xbf16>
    %30 = vector.shape_cast %29 : vector<1x8x16xbf16> to vector<8x16xbf16>
    %cst_17 = arith.constant dense<0.000000e+00> : vector<8x288xf32>
    %31 = tpu.matmul %30, %28, %cst_17 {dimension_numbers = #tpu.dot_dimension_numbers<[1], [0], [0], [1], [0, 0, 1, 1], [], []>} : vector<8x16xbf16>, vector<16x288xbf16>, vector<8x288xf32> -> vector<8x288xf32>
    %32 = arith.addf %26, %31 : vector<8x288xf32>
    %c0_18 = arith.constant 0 : index
    %c1 = arith.constant 1 : index
    %33 = vector.load %arg12[%c0_18, %c1] : memref<16x384xf32, #tpu.memory_space<vmem>>, vector<16x288xf32>
    %34 = arith.truncf %33 : vector<16x288xf32> to vector<16x288xbf16>
    %c1_19 = arith.constant 1 : index
    %c0_20 = arith.constant 0 : index
    %c0_21 = arith.constant 0 : index
    %35 = vector.load %arg4[%c1_19, %c0_20, %c0_21] : memref<9x8x16xbf16, #tpu.memory_space<vmem>>, vector<1x8x16xbf16>
    %36 = vector.shape_cast %35 : vector<1x8x16xbf16> to vector<8x16xbf16>
    %cst_22 = arith.constant dense<0.000000e+00> : vector<8x288xf32>
    %37 = tpu.matmul %36, %34, %cst_22 {dimension_numbers = #tpu.dot_dimension_numbers<[1], [0], [0], [1], [0, 0, 1, 1], [], []>} : vector<8x16xbf16>, vector<16x288xbf16>, vector<8x288xf32> -> vector<8x288xf32>
    %38 = arith.addf %32, %37 : vector<8x288xf32>
    %c0_23 = arith.constant 0 : index
    %c2 = arith.constant 2 : index
    %39 = vector.load %arg12[%c0_23, %c2] : memref<16x384xf32, #tpu.memory_space<vmem>>, vector<16x288xf32>
    %40 = arith.truncf %39 : vector<16x288xf32> to vector<16x288xbf16>
    %c2_24 = arith.constant 2 : index
    %c0_25 = arith.constant 0 : index
    %c0_26 = arith.constant 0 : index
    %41 = vector.load %arg4[%c2_24, %c0_25, %c0_26] : memref<9x8x16xbf16, #tpu.memory_space<vmem>>, vector<1x8x16xbf16>
    %42 = vector.shape_cast %41 : vector<1x8x16xbf16> to vector<8x16xbf16>
    %cst_27 = arith.constant dense<0.000000e+00> : vector<8x288xf32>
    %43 = tpu.matmul %42, %40, %cst_27 {dimension_numbers = #tpu.dot_dimension_numbers<[1], [0], [0], [1], [0, 0, 1, 1], [], []>} : vector<8x16xbf16>, vector<16x288xbf16>, vector<8x288xf32> -> vector<8x288xf32>
    %44 = arith.addf %38, %43 : vector<8x288xf32>
    %c0_28 = arith.constant 0 : index
    %c18 = arith.constant 18 : index
    %45 = vector.load %arg12[%c0_28, %c18] : memref<16x384xf32, #tpu.memory_space<vmem>>, vector<16x288xf32>
    %46 = arith.truncf %45 : vector<16x288xf32> to vector<16x288xbf16>
    %c3 = arith.constant 3 : index
    %c0_29 = arith.constant 0 : index
    %c0_30 = arith.constant 0 : index
    %47 = vector.load %arg4[%c3, %c0_29, %c0_30] : memref<9x8x16xbf16, #tpu.memory_space<vmem>>, vector<1x8x16xbf16>
    %48 = vector.shape_cast %47 : vector<1x8x16xbf16> to vector<8x16xbf16>
    %cst_31 = arith.constant dense<0.000000e+00> : vector<8x288xf32>
    %49 = tpu.matmul %48, %46, %cst_31 {dimension_numbers = #tpu.dot_dimension_numbers<[1], [0], [0], [1], [0, 0, 1, 1], [], []>} : vector<8x16xbf16>, vector<16x288xbf16>, vector<8x288xf32> -> vector<8x288xf32>
    %50 = arith.addf %44, %49 : vector<8x288xf32>
    %c0_32 = arith.constant 0 : index
    %c19 = arith.constant 19 : index
    %51 = vector.load %arg12[%c0_32, %c19] : memref<16x384xf32, #tpu.memory_space<vmem>>, vector<16x288xf32>
    %52 = arith.truncf %51 : vector<16x288xf32> to vector<16x288xbf16>
    %c4 = arith.constant 4 : index
    %c0_33 = arith.constant 0 : index
    %c0_34 = arith.constant 0 : index
    %53 = vector.load %arg4[%c4, %c0_33, %c0_34] : memref<9x8x16xbf16, #tpu.memory_space<vmem>>, vector<1x8x16xbf16>
    %54 = vector.shape_cast %53 : vector<1x8x16xbf16> to vector<8x16xbf16>
    %cst_35 = arith.constant dense<0.000000e+00> : vector<8x288xf32>
    %55 = tpu.matmul %54, %52, %cst_35 {dimension_numbers = #tpu.dot_dimension_numbers<[1], [0], [0], [1], [0, 0, 1, 1], [], []>} : vector<8x16xbf16>, vector<16x288xbf16>, vector<8x288xf32> -> vector<8x288xf32>
    %56 = arith.addf %50, %55 : vector<8x288xf32>
    %c0_36 = arith.constant 0 : index
    %c20 = arith.constant 20 : index
    %57 = vector.load %arg12[%c0_36, %c20] : memref<16x384xf32, #tpu.memory_space<vmem>>, vector<16x288xf32>
    %58 = arith.truncf %57 : vector<16x288xf32> to vector<16x288xbf16>
    %c5 = arith.constant 5 : index
    %c0_37 = arith.constant 0 : index
    %c0_38 = arith.constant 0 : index
    %59 = vector.load %arg4[%c5, %c0_37, %c0_38] : memref<9x8x16xbf16, #tpu.memory_space<vmem>>, vector<1x8x16xbf16>
    %60 = vector.shape_cast %59 : vector<1x8x16xbf16> to vector<8x16xbf16>
    %cst_39 = arith.constant dense<0.000000e+00> : vector<8x288xf32>
    %61 = tpu.matmul %60, %58, %cst_39 {dimension_numbers = #tpu.dot_dimension_numbers<[1], [0], [0], [1], [0, 0, 1, 1], [], []>} : vector<8x16xbf16>, vector<16x288xbf16>, vector<8x288xf32> -> vector<8x288xf32>
    %62 = arith.addf %56, %61 : vector<8x288xf32>
    %c0_40 = arith.constant 0 : index
    %c36 = arith.constant 36 : index
    %63 = vector.load %arg12[%c0_40, %c36] : memref<16x384xf32, #tpu.memory_space<vmem>>, vector<16x288xf32>
    %64 = arith.truncf %63 : vector<16x288xf32> to vector<16x288xbf16>
    %c6 = arith.constant 6 : index
    %c0_41 = arith.constant 0 : index
    %c0_42 = arith.constant 0 : index
    %65 = vector.load %arg4[%c6, %c0_41, %c0_42] : memref<9x8x16xbf16, #tpu.memory_space<vmem>>, vector<1x8x16xbf16>
    %66 = vector.shape_cast %65 : vector<1x8x16xbf16> to vector<8x16xbf16>
    %cst_43 = arith.constant dense<0.000000e+00> : vector<8x288xf32>
    %67 = tpu.matmul %66, %64, %cst_43 {dimension_numbers = #tpu.dot_dimension_numbers<[1], [0], [0], [1], [0, 0, 1, 1], [], []>} : vector<8x16xbf16>, vector<16x288xbf16>, vector<8x288xf32> -> vector<8x288xf32>
    %68 = arith.addf %62, %67 : vector<8x288xf32>
    %c0_44 = arith.constant 0 : index
    %c37 = arith.constant 37 : index
    %69 = vector.load %arg12[%c0_44, %c37] : memref<16x384xf32, #tpu.memory_space<vmem>>, vector<16x288xf32>
    %70 = arith.truncf %69 : vector<16x288xf32> to vector<16x288xbf16>
    %c7 = arith.constant 7 : index
    %c0_45 = arith.constant 0 : index
    %c0_46 = arith.constant 0 : index
    %71 = vector.load %arg4[%c7, %c0_45, %c0_46] : memref<9x8x16xbf16, #tpu.memory_space<vmem>>, vector<1x8x16xbf16>
    %72 = vector.shape_cast %71 : vector<1x8x16xbf16> to vector<8x16xbf16>
    %cst_47 = arith.constant dense<0.000000e+00> : vector<8x288xf32>
    %73 = tpu.matmul %72, %70, %cst_47 {dimension_numbers = #tpu.dot_dimension_numbers<[1], [0], [0], [1], [0, 0, 1, 1], [], []>} : vector<8x16xbf16>, vector<16x288xbf16>, vector<8x288xf32> -> vector<8x288xf32>
    %74 = arith.addf %68, %73 : vector<8x288xf32>
    %c0_48 = arith.constant 0 : index
    %c38 = arith.constant 38 : index
    %75 = vector.load %arg12[%c0_48, %c38] : memref<16x384xf32, #tpu.memory_space<vmem>>, vector<16x288xf32>
    %76 = arith.truncf %75 : vector<16x288xf32> to vector<16x288xbf16>
    %c8 = arith.constant 8 : index
    %c0_49 = arith.constant 0 : index
    %c0_50 = arith.constant 0 : index
    %77 = vector.load %arg4[%c8, %c0_49, %c0_50] : memref<9x8x16xbf16, #tpu.memory_space<vmem>>, vector<1x8x16xbf16>
    %78 = vector.shape_cast %77 : vector<1x8x16xbf16> to vector<8x16xbf16>
    %cst_51 = arith.constant dense<0.000000e+00> : vector<8x288xf32>
    %79 = tpu.matmul %78, %76, %cst_51 {dimension_numbers = #tpu.dot_dimension_numbers<[1], [0], [0], [1], [0, 0, 1, 1], [], []>} : vector<8x16xbf16>, vector<16x288xbf16>, vector<8x288xf32> -> vector<8x288xf32>
    %80 = arith.addf %74, %79 : vector<8x288xf32>
    %c0_52 = arith.constant 0 : index
    %c0_53 = arith.constant 0 : index
    %81 = vector.load %arg5[%c0_52, %c0_53] : memref<8x1xf32, #tpu.memory_space<vmem>>, vector<8x1xf32>
    %82 = vector.broadcast %81 : vector<8x1xf32> to vector<8x288xf32>
    %83 = arith.mulf %80, %82 : vector<8x288xf32>
    %c0_54 = arith.constant 0 : index
    %c0_55 = arith.constant 0 : index
    %84 = vector.load %arg6[%c0_54, %c0_55] : memref<8x1xf32, #tpu.memory_space<vmem>>, vector<8x1xf32>
    %85 = vector.broadcast %84 : vector<8x1xf32> to vector<8x288xf32>
    %86 = arith.addf %83, %85 : vector<8x288xf32>
    %cst_56 = arith.constant 0.000000e+00 : f32
    %87 = vector.broadcast %cst_56 : f32 to vector<8x288xf32>
    %88 = arith.cmpf oge, %86, %87 : vector<8x288xf32>
    %cst_57 = arith.constant 0.00999999977 : f32
    %89 = vector.broadcast %cst_57 : f32 to vector<8x288xf32>
    %90 = arith.mulf %89, %86 : vector<8x288xf32>
    %91 = arith.select %88, %86, %90 : vector<8x288xi1>, vector<8x288xf32>
    %cst_58 = arith.constant 0.000000e+00 : f32
    %92 = vector.broadcast %cst_58 : f32 to vector<8x288xf32>
    %93 = arith.select %18, %91, %92 : vector<8x288xi1>, vector<8x288xf32>
    %cst_59 = arith.constant 0.000000e+00 : f32
    %94 = vector.broadcast %cst_59 : f32 to vector<8x384xf32>
    %c0_60 = arith.constant 0 : index
    %c0_61 = arith.constant 0 : index
    %95 = vector.load %arg13[%c0_60, %c0_61] : memref<8x384xf32, #tpu.memory_space<vmem>>, vector<8x384xf32>
    tpu.vector_store %arg13[%c0_60, %c0_61], %94 {strides = array<i32>} : memref<8x384xf32, #tpu.memory_space<vmem>>, vector<8x384xf32>,
    %c0_62 = arith.constant 0 : index
    %c19_63 = arith.constant 19 : index
    %96 = vector.load %arg13[%c0_62, %c19_63] : memref<8x384xf32, #tpu.memory_space<vmem>>, vector<8x288xf32>
    tpu.vector_store %arg13[%c0_62, %c19_63], %93 {strides = array<i32>} : memref<8x384xf32, #tpu.memory_space<vmem>>, vector<8x288xf32>,
    %cst_64 = arith.constant 0.000000e+00 : f32
    %97 = vector.broadcast %cst_64 : f32 to vector<8x288xf32>
    %c0_65 = arith.constant 0 : index
    %c0_66 = arith.constant 0 : index
    %98 = vector.load %arg13[%c0_65, %c0_66] : memref<8x384xf32, #tpu.memory_space<vmem>>, vector<8x288xf32>
    %99 = arith.truncf %98 : vector<8x288xf32> to vector<8x288xbf16>
    %c0_67 = arith.constant 0 : index
    %c0_68 = arith.constant 0 : index
    %c0_69 = arith.constant 0 : index
    %100 = vector.load %arg7[%c0_67, %c0_68, %c0_69] : memref<9x8x8xbf16, #tpu.memory_space<vmem>>, vector<1x8x8xbf16>
    %101 = vector.shape_cast %100 : vector<1x8x8xbf16> to vector<8x8xbf16>
    %cst_70 = arith.constant dense<0.000000e+00> : vector<8x288xf32>
    %102 = tpu.matmul %101, %99, %cst_70 {dimension_numbers = #tpu.dot_dimension_numbers<[1], [0], [0], [1], [0, 0, 1, 1], [], []>} : vector<8x8xbf16>, vector<8x288xbf16>, vector<8x288xf32> -> vector<8x288xf32>
    %103 = arith.addf %97, %102 : vector<8x288xf32>
    %c0_71 = arith.constant 0 : index
    %c1_72 = arith.constant 1 : index
    %104 = vector.load %arg13[%c0_71, %c1_72] : memref<8x384xf32, #tpu.memory_space<vmem>>, vector<8x288xf32>
    %105 = arith.truncf %104 : vector<8x288xf32> to vector<8x288xbf16>
    %c1_73 = arith.constant 1 : index
    %c0_74 = arith.constant 0 : index
    %c0_75 = arith.constant 0 : index
    %106 = vector.load %arg7[%c1_73, %c0_74, %c0_75] : memref<9x8x8xbf16, #tpu.memory_space<vmem>>, vector<1x8x8xbf16>
    %107 = vector.shape_cast %106 : vector<1x8x8xbf16> to vector<8x8xbf16>
    %cst_76 = arith.constant dense<0.000000e+00> : vector<8x288xf32>
    %108 = tpu.matmul %107, %105, %cst_76 {dimension_numbers = #tpu.dot_dimension_numbers<[1], [0], [0], [1], [0, 0, 1, 1], [], []>} : vector<8x8xbf16>, vector<8x288xbf16>, vector<8x288xf32> -> vector<8x288xf32>
    %109 = arith.addf %103, %108 : vector<8x288xf32>
    %c0_77 = arith.constant 0 : index
    %c2_78 = arith.constant 2 : index
    %110 = vector.load %arg13[%c0_77, %c2_78] : memref<8x384xf32, #tpu.memory_space<vmem>>, vector<8x288xf32>
    %111 = arith.truncf %110 : vector<8x288xf32> to vector<8x288xbf16>
    %c2_79 = arith.constant 2 : index
    %c0_80 = arith.constant 0 : index
    %c0_81 = arith.constant 0 : index
    %112 = vector.load %arg7[%c2_79, %c0_80, %c0_81] : memref<9x8x8xbf16, #tpu.memory_space<vmem>>, vector<1x8x8xbf16>
    %113 = vector.shape_cast %112 : vector<1x8x8xbf16> to vector<8x8xbf16>
    %cst_82 = arith.constant dense<0.000000e+00> : vector<8x288xf32>
    %114 = tpu.matmul %113, %111, %cst_82 {dimension_numbers = #tpu.dot_dimension_numbers<[1], [0], [0], [1], [0, 0, 1, 1], [], []>} : vector<8x8xbf16>, vector<8x288xbf16>, vector<8x288xf32> -> vector<8x288xf32>
    %115 = arith.addf %109, %114 : vector<8x288xf32>
    %c0_83 = arith.constant 0 : index
    %c18_84 = arith.constant 18 : index
    %116 = vector.load %arg13[%c0_83, %c18_84] : memref<8x384xf32, #tpu.memory_space<vmem>>, vector<8x288xf32>
    %117 = arith.truncf %116 : vector<8x288xf32> to vector<8x288xbf16>
    %c3_85 = arith.constant 3 : index
    %c0_86 = arith.constant 0 : index
    %c0_87 = arith.constant 0 : index
    %118 = vector.load %arg7[%c3_85, %c0_86, %c0_87] : memref<9x8x8xbf16, #tpu.memory_space<vmem>>, vector<1x8x8xbf16>
    %119 = vector.shape_cast %118 : vector<1x8x8xbf16> to vector<8x8xbf16>
    %cst_88 = arith.constant dense<0.000000e+00> : vector<8x288xf32>
    %120 = tpu.matmul %119, %117, %cst_88 {dimension_numbers = #tpu.dot_dimension_numbers<[1], [0], [0], [1], [0, 0, 1, 1], [], []>} : vector<8x8xbf16>, vector<8x288xbf16>, vector<8x288xf32> -> vector<8x288xf32>
    %121 = arith.addf %115, %120 : vector<8x288xf32>
    %c0_89 = arith.constant 0 : index
    %c19_90 = arith.constant 19 : index
    %122 = vector.load %arg13[%c0_89, %c19_90] : memref<8x384xf32, #tpu.memory_space<vmem>>, vector<8x288xf32>
    %123 = arith.truncf %122 : vector<8x288xf32> to vector<8x288xbf16>
    %c4_91 = arith.constant 4 : index
    %c0_92 = arith.constant 0 : index
    %c0_93 = arith.constant 0 : index
    %124 = vector.load %arg7[%c4_91, %c0_92, %c0_93] : memref<9x8x8xbf16, #tpu.memory_space<vmem>>, vector<1x8x8xbf16>
    %125 = vector.shape_cast %124 : vector<1x8x8xbf16> to vector<8x8xbf16>
    %cst_94 = arith.constant dense<0.000000e+00> : vector<8x288xf32>
    %126 = tpu.matmul %125, %123, %cst_94 {dimension_numbers = #tpu.dot_dimension_numbers<[1], [0], [0], [1], [0, 0, 1, 1], [], []>} : vector<8x8xbf16>, vector<8x288xbf16>, vector<8x288xf32> -> vector<8x288xf32>
    %127 = arith.addf %121, %126 : vector<8x288xf32>
    %c0_95 = arith.constant 0 : index
    %c20_96 = arith.constant 20 : index
    %128 = vector.load %arg13[%c0_95, %c20_96] : memref<8x384xf32, #tpu.memory_space<vmem>>, vector<8x288xf32>
    %129 = arith.truncf %128 : vector<8x288xf32> to vector<8x288xbf16>
    %c5_97 = arith.constant 5 : index
    %c0_98 = arith.constant 0 : index
    %c0_99 = arith.constant 0 : index
    %130 = vector.load %arg7[%c5_97, %c0_98, %c0_99] : memref<9x8x8xbf16, #tpu.memory_space<vmem>>, vector<1x8x8xbf16>
    %131 = vector.shape_cast %130 : vector<1x8x8xbf16> to vector<8x8xbf16>
    %cst_100 = arith.constant dense<0.000000e+00> : vector<8x288xf32>
    %132 = tpu.matmul %131, %129, %cst_100 {dimension_numbers = #tpu.dot_dimension_numbers<[1], [0], [0], [1], [0, 0, 1, 1], [], []>} : vector<8x8xbf16>, vector<8x288xbf16>, vector<8x288xf32> -> vector<8x288xf32>
    %133 = arith.addf %127, %132 : vector<8x288xf32>
    %c0_101 = arith.constant 0 : index
    %c36_102 = arith.constant 36 : index
    %134 = vector.load %arg13[%c0_101, %c36_102] : memref<8x384xf32, #tpu.memory_space<vmem>>, vector<8x288xf32>
    %135 = arith.truncf %134 : vector<8x288xf32> to vector<8x288xbf16>
    %c6_103 = arith.constant 6 : index
    %c0_104 = arith.constant 0 : index
    %c0_105 = arith.constant 0 : index
    %136 = vector.load %arg7[%c6_103, %c0_104, %c0_105] : memref<9x8x8xbf16, #tpu.memory_space<vmem>>, vector<1x8x8xbf16>
    %137 = vector.shape_cast %136 : vector<1x8x8xbf16> to vector<8x8xbf16>
    %cst_106 = arith.constant dense<0.000000e+00> : vector<8x288xf32>
    %138 = tpu.matmul %137, %135, %cst_106 {dimension_numbers = #tpu.dot_dimension_numbers<[1], [0], [0], [1], [0, 0, 1, 1], [], []>} : vector<8x8xbf16>, vector<8x288xbf16>, vector<8x288xf32> -> vector<8x288xf32>
    %139 = arith.addf %133, %138 : vector<8x288xf32>
    %c0_107 = arith.constant 0 : index
    %c37_108 = arith.constant 37 : index
    %140 = vector.load %arg13[%c0_107, %c37_108] : memref<8x384xf32, #tpu.memory_space<vmem>>, vector<8x288xf32>
    %141 = arith.truncf %140 : vector<8x288xf32> to vector<8x288xbf16>
    %c7_109 = arith.constant 7 : index
    %c0_110 = arith.constant 0 : index
    %c0_111 = arith.constant 0 : index
    %142 = vector.load %arg7[%c7_109, %c0_110, %c0_111] : memref<9x8x8xbf16, #tpu.memory_space<vmem>>, vector<1x8x8xbf16>
    %143 = vector.shape_cast %142 : vector<1x8x8xbf16> to vector<8x8xbf16>
    %cst_112 = arith.constant dense<0.000000e+00> : vector<8x288xf32>
    %144 = tpu.matmul %143, %141, %cst_112 {dimension_numbers = #tpu.dot_dimension_numbers<[1], [0], [0], [1], [0, 0, 1, 1], [], []>} : vector<8x8xbf16>, vector<8x288xbf16>, vector<8x288xf32> -> vector<8x288xf32>
    %145 = arith.addf %139, %144 : vector<8x288xf32>
    %c0_113 = arith.constant 0 : index
    %c38_114 = arith.constant 38 : index
    %146 = vector.load %arg13[%c0_113, %c38_114] : memref<8x384xf32, #tpu.memory_space<vmem>>, vector<8x288xf32>
    %147 = arith.truncf %146 : vector<8x288xf32> to vector<8x288xbf16>
    %c8_115 = arith.constant 8 : index
    %c0_116 = arith.constant 0 : index
    %c0_117 = arith.constant 0 : index
    %148 = vector.load %arg7[%c8_115, %c0_116, %c0_117] : memref<9x8x8xbf16, #tpu.memory_space<vmem>>, vector<1x8x8xbf16>
    %149 = vector.shape_cast %148 : vector<1x8x8xbf16> to vector<8x8xbf16>
    %cst_118 = arith.constant dense<0.000000e+00> : vector<8x288xf32>
    %150 = tpu.matmul %149, %147, %cst_118 {dimension_numbers = #tpu.dot_dimension_numbers<[1], [0], [0], [1], [0, 0, 1, 1], [], []>} : vector<8x8xbf16>, vector<8x288xbf16>, vector<8x288xf32> -> vector<8x288xf32>
    %151 = arith.addf %145, %150 : vector<8x288xf32>
    %c0_119 = arith.constant 0 : index
    %c0_120 = arith.constant 0 : index
    %152 = vector.load %arg8[%c0_119, %c0_120] : memref<8x1xf32, #tpu.memory_space<vmem>>, vector<8x1xf32>
    %153 = vector.broadcast %152 : vector<8x1xf32> to vector<8x288xf32>
    %154 = arith.mulf %151, %153 : vector<8x288xf32>
    %c0_121 = arith.constant 0 : index
    %c0_122 = arith.constant 0 : index
    %155 = vector.load %arg9[%c0_121, %c0_122] : memref<8x1xf32, #tpu.memory_space<vmem>>, vector<8x1xf32>
    %156 = vector.broadcast %155 : vector<8x1xf32> to vector<8x288xf32>
    %157 = arith.addf %154, %156 : vector<8x288xf32>
    %cst_123 = arith.constant 0.000000e+00 : f32
    %158 = vector.broadcast %cst_123 : f32 to vector<8x288xf32>
    %159 = arith.cmpf oge, %157, %158 : vector<8x288xf32>
    %cst_124 = arith.constant 0.00999999977 : f32
    %160 = vector.broadcast %cst_124 : f32 to vector<8x288xf32>
    %161 = arith.mulf %160, %157 : vector<8x288xf32>
    %162 = arith.select %159, %157, %161 : vector<8x288xi1>, vector<8x288xf32>
    %cst_125 = arith.constant 0.000000e+00 : f32
    %163 = vector.broadcast %cst_125 : f32 to vector<8x288xf32>
    %164 = arith.select %18, %162, %163 : vector<8x288xi1>, vector<8x288xf32>
    %cst_126 = arith.constant 0.000000e+00 : f32
    %165 = vector.broadcast %cst_126 : f32 to vector<8x384xf32>
    %c0_127 = arith.constant 0 : index
    %c0_128 = arith.constant 0 : index
    %166 = vector.load %arg14[%c0_127, %c0_128] : memref<8x384xf32, #tpu.memory_space<vmem>>, vector<8x384xf32>
    tpu.vector_store %arg14[%c0_127, %c0_128], %165 {strides = array<i32>} : memref<8x384xf32, #tpu.memory_space<vmem>>, vector<8x384xf32>,
    %c0_129 = arith.constant 0 : index
    %c19_130 = arith.constant 19 : index
    %167 = vector.load %arg14[%c0_129, %c19_130] : memref<8x384xf32, #tpu.memory_space<vmem>>, vector<8x288xf32>
    tpu.vector_store %arg14[%c0_129, %c19_130], %164 {strides = array<i32>} : memref<8x384xf32, #tpu.memory_space<vmem>>, vector<8x288xf32>,
    %cst_131 = arith.constant 0.000000e+00 : f32
    %168 = vector.broadcast %cst_131 : f32 to vector<1x288xf32>
    %c0_132 = arith.constant 0 : index
    %c0_133 = arith.constant 0 : index
    %169 = vector.load %arg14[%c0_132, %c0_133] : memref<8x384xf32, #tpu.memory_space<vmem>>, vector<8x288xf32>
    %170 = arith.truncf %169 : vector<8x288xf32> to vector<8x288xbf16>
    %c0_134 = arith.constant 0 : index
    %c0_135 = arith.constant 0 : index
    %c0_136 = arith.constant 0 : index
    %171 = vector.load %arg10[%c0_134, %c0_135, %c0_136] : memref<9x1x8xbf16, #tpu.memory_space<vmem>>, vector<1x1x8xbf16>
    %172 = vector.shape_cast %171 : vector<1x1x8xbf16> to vector<1x8xbf16>
    %cst_137 = arith.constant dense<0.000000e+00> : vector<1x288xf32>
    %173 = tpu.matmul %172, %170, %cst_137 {dimension_numbers = #tpu.dot_dimension_numbers<[1], [0], [0], [1], [0, 0, 1, 1], [], []>} : vector<1x8xbf16>, vector<8x288xbf16>, vector<1x288xf32> -> vector<1x288xf32>
    %174 = arith.addf %168, %173 : vector<1x288xf32>
    %c0_138 = arith.constant 0 : index
    %c1_139 = arith.constant 1 : index
    %175 = vector.load %arg14[%c0_138, %c1_139] : memref<8x384xf32, #tpu.memory_space<vmem>>, vector<8x288xf32>
    %176 = arith.truncf %175 : vector<8x288xf32> to vector<8x288xbf16>
    %c1_140 = arith.constant 1 : index
    %c0_141 = arith.constant 0 : index
    %c0_142 = arith.constant 0 : index
    %177 = vector.load %arg10[%c1_140, %c0_141, %c0_142] : memref<9x1x8xbf16, #tpu.memory_space<vmem>>, vector<1x1x8xbf16>
    %178 = vector.shape_cast %177 : vector<1x1x8xbf16> to vector<1x8xbf16>
    %cst_143 = arith.constant dense<0.000000e+00> : vector<1x288xf32>
    %179 = tpu.matmul %178, %176, %cst_143 {dimension_numbers = #tpu.dot_dimension_numbers<[1], [0], [0], [1], [0, 0, 1, 1], [], []>} : vector<1x8xbf16>, vector<8x288xbf16>, vector<1x288xf32> -> vector<1x288xf32>
    %180 = arith.addf %174, %179 : vector<1x288xf32>
    %c0_144 = arith.constant 0 : index
    %c2_145 = arith.constant 2 : index
    %181 = vector.load %arg14[%c0_144, %c2_145] : memref<8x384xf32, #tpu.memory_space<vmem>>, vector<8x288xf32>
    %182 = arith.truncf %181 : vector<8x288xf32> to vector<8x288xbf16>
    %c2_146 = arith.constant 2 : index
    %c0_147 = arith.constant 0 : index
    %c0_148 = arith.constant 0 : index
    %183 = vector.load %arg10[%c2_146, %c0_147, %c0_148] : memref<9x1x8xbf16, #tpu.memory_space<vmem>>, vector<1x1x8xbf16>
    %184 = vector.shape_cast %183 : vector<1x1x8xbf16> to vector<1x8xbf16>
    %cst_149 = arith.constant dense<0.000000e+00> : vector<1x288xf32>
    %185 = tpu.matmul %184, %182, %cst_149 {dimension_numbers = #tpu.dot_dimension_numbers<[1], [0], [0], [1], [0, 0, 1, 1], [], []>} : vector<1x8xbf16>, vector<8x288xbf16>, vector<1x288xf32> -> vector<1x288xf32>
    %186 = arith.addf %180, %185 : vector<1x288xf32>
    %c0_150 = arith.constant 0 : index
    %c18_151 = arith.constant 18 : index
    %187 = vector.load %arg14[%c0_150, %c18_151] : memref<8x384xf32, #tpu.memory_space<vmem>>, vector<8x288xf32>
    %188 = arith.truncf %187 : vector<8x288xf32> to vector<8x288xbf16>
    %c3_152 = arith.constant 3 : index
    %c0_153 = arith.constant 0 : index
    %c0_154 = arith.constant 0 : index
    %189 = vector.load %arg10[%c3_152, %c0_153, %c0_154] : memref<9x1x8xbf16, #tpu.memory_space<vmem>>, vector<1x1x8xbf16>
    %190 = vector.shape_cast %189 : vector<1x1x8xbf16> to vector<1x8xbf16>
    %cst_155 = arith.constant dense<0.000000e+00> : vector<1x288xf32>
    %191 = tpu.matmul %190, %188, %cst_155 {dimension_numbers = #tpu.dot_dimension_numbers<[1], [0], [0], [1], [0, 0, 1, 1], [], []>} : vector<1x8xbf16>, vector<8x288xbf16>, vector<1x288xf32> -> vector<1x288xf32>
    %192 = arith.addf %186, %191 : vector<1x288xf32>
    %c0_156 = arith.constant 0 : index
    %c19_157 = arith.constant 19 : index
    %193 = vector.load %arg14[%c0_156, %c19_157] : memref<8x384xf32, #tpu.memory_space<vmem>>, vector<8x288xf32>
    %194 = arith.truncf %193 : vector<8x288xf32> to vector<8x288xbf16>
    %c4_158 = arith.constant 4 : index
    %c0_159 = arith.constant 0 : index
    %c0_160 = arith.constant 0 : index
    %195 = vector.load %arg10[%c4_158, %c0_159, %c0_160] : memref<9x1x8xbf16, #tpu.memory_space<vmem>>, vector<1x1x8xbf16>
    %196 = vector.shape_cast %195 : vector<1x1x8xbf16> to vector<1x8xbf16>
    %cst_161 = arith.constant dense<0.000000e+00> : vector<1x288xf32>
    %197 = tpu.matmul %196, %194, %cst_161 {dimension_numbers = #tpu.dot_dimension_numbers<[1], [0], [0], [1], [0, 0, 1, 1], [], []>} : vector<1x8xbf16>, vector<8x288xbf16>, vector<1x288xf32> -> vector<1x288xf32>
    %198 = arith.addf %192, %197 : vector<1x288xf32>
    %c0_162 = arith.constant 0 : index
    %c20_163 = arith.constant 20 : index
    %199 = vector.load %arg14[%c0_162, %c20_163] : memref<8x384xf32, #tpu.memory_space<vmem>>, vector<8x288xf32>
    %200 = arith.truncf %199 : vector<8x288xf32> to vector<8x288xbf16>
    %c5_164 = arith.constant 5 : index
    %c0_165 = arith.constant 0 : index
    %c0_166 = arith.constant 0 : index
    %201 = vector.load %arg10[%c5_164, %c0_165, %c0_166] : memref<9x1x8xbf16, #tpu.memory_space<vmem>>, vector<1x1x8xbf16>
    %202 = vector.shape_cast %201 : vector<1x1x8xbf16> to vector<1x8xbf16>
    %cst_167 = arith.constant dense<0.000000e+00> : vector<1x288xf32>
    %203 = tpu.matmul %202, %200, %cst_167 {dimension_numbers = #tpu.dot_dimension_numbers<[1], [0], [0], [1], [0, 0, 1, 1], [], []>} : vector<1x8xbf16>, vector<8x288xbf16>, vector<1x288xf32> -> vector<1x288xf32>
    %204 = arith.addf %198, %203 : vector<1x288xf32>
    %c0_168 = arith.constant 0 : index
    %c36_169 = arith.constant 36 : index
    %205 = vector.load %arg14[%c0_168, %c36_169] : memref<8x384xf32, #tpu.memory_space<vmem>>, vector<8x288xf32>
    %206 = arith.truncf %205 : vector<8x288xf32> to vector<8x288xbf16>
    %c6_170 = arith.constant 6 : index
    %c0_171 = arith.constant 0 : index
    %c0_172 = arith.constant 0 : index
    %207 = vector.load %arg10[%c6_170, %c0_171, %c0_172] : memref<9x1x8xbf16, #tpu.memory_space<vmem>>, vector<1x1x8xbf16>
    %208 = vector.shape_cast %207 : vector<1x1x8xbf16> to vector<1x8xbf16>
    %cst_173 = arith.constant dense<0.000000e+00> : vector<1x288xf32>
    %209 = tpu.matmul %208, %206, %cst_173 {dimension_numbers = #tpu.dot_dimension_numbers<[1], [0], [0], [1], [0, 0, 1, 1], [], []>} : vector<1x8xbf16>, vector<8x288xbf16>, vector<1x288xf32> -> vector<1x288xf32>
    %210 = arith.addf %204, %209 : vector<1x288xf32>
    %c0_174 = arith.constant 0 : index
    %c37_175 = arith.constant 37 : index
    %211 = vector.load %arg14[%c0_174, %c37_175] : memref<8x384xf32, #tpu.memory_space<vmem>>, vector<8x288xf32>
    %212 = arith.truncf %211 : vector<8x288xf32> to vector<8x288xbf16>
    %c7_176 = arith.constant 7 : index
    %c0_177 = arith.constant 0 : index
    %c0_178 = arith.constant 0 : index
    %213 = vector.load %arg10[%c7_176, %c0_177, %c0_178] : memref<9x1x8xbf16, #tpu.memory_space<vmem>>, vector<1x1x8xbf16>
    %214 = vector.shape_cast %213 : vector<1x1x8xbf16> to vector<1x8xbf16>
    %cst_179 = arith.constant dense<0.000000e+00> : vector<1x288xf32>
    %215 = tpu.matmul %214, %212, %cst_179 {dimension_numbers = #tpu.dot_dimension_numbers<[1], [0], [0], [1], [0, 0, 1, 1], [], []>} : vector<1x8xbf16>, vector<8x288xbf16>, vector<1x288xf32> -> vector<1x288xf32>
    %216 = arith.addf %210, %215 : vector<1x288xf32>
    %c0_180 = arith.constant 0 : index
    %c38_181 = arith.constant 38 : index
    %217 = vector.load %arg14[%c0_180, %c38_181] : memref<8x384xf32, #tpu.memory_space<vmem>>, vector<8x288xf32>
    %218 = arith.truncf %217 : vector<8x288xf32> to vector<8x288xbf16>
    %c8_182 = arith.constant 8 : index
    %c0_183 = arith.constant 0 : index
    %c0_184 = arith.constant 0 : index
    %219 = vector.load %arg10[%c8_182, %c0_183, %c0_184] : memref<9x1x8xbf16, #tpu.memory_space<vmem>>, vector<1x1x8xbf16>
    %220 = vector.shape_cast %219 : vector<1x1x8xbf16> to vector<1x8xbf16>
    %cst_185 = arith.constant dense<0.000000e+00> : vector<1x288xf32>
    %221 = tpu.matmul %220, %218, %cst_185 {dimension_numbers = #tpu.dot_dimension_numbers<[1], [0], [0], [1], [0, 0, 1, 1], [], []>} : vector<1x8xbf16>, vector<8x288xbf16>, vector<1x288xf32> -> vector<1x288xf32>
    %222 = arith.addf %216, %221 : vector<1x288xf32>
    %223 = arith.negf %222 : vector<1x288xf32>
    %224 = math.exp %223 : vector<1x288xf32>
    %cst_186 = arith.constant 1.000000e+00 : f32
    %225 = vector.broadcast %cst_186 : f32 to vector<1x288xf32>
    %226 = arith.addf %225, %224 : vector<1x288xf32>
    %227 = arith.divf %225, %226 : vector<1x288xf32>
    %c0_187 = arith.constant 0 : index
    %c0_188 = arith.constant 0 : index
    %c0_189 = arith.constant 0 : index
    %228 = vector.load %arg11[%c0_187, %c0_188, %c0_189] : memref<1x1x288xf32, #tpu.memory_space<vmem>>, vector<1x1x288xf32>
    %229 = vector.shape_cast %228 : vector<1x1x288xf32> to vector<1x288xf32>
    %230 = vector.shape_cast %227 : vector<1x288xf32> to vector<1x1x288xf32>
    tpu.vector_store %arg11[%c0_187, %c0_188, %c0_189], %230 {strides = array<i32>} : memref<1x1x288xf32, #tpu.memory_space<vmem>>, vector<1x1x288xf32>,
    return
  }
  func.func @transform_0(%arg0: i32) -> (i32, i32, i32) {
    %c0_i32 = arith.constant 0 : i32
    %c0_i32_0 = arith.constant 0 : i32
    %c0_i32_1 = arith.constant 0 : i32
    return %arg0, %c0_i32, %c0_i32_0 : i32, i32, i32
  }
  func.func @transform_1(%arg0: i32) -> (i32, i32) {
    %c0_i32 = arith.constant 0 : i32
    %c0_i32_0 = arith.constant 0 : i32
    %c0_i32_1 = arith.constant 0 : i32
    return %c0_i32, %c0_i32_0 : i32, i32
  }
  func.func @transform_2(%arg0: i32) -> (i32, i32) {
    %c0_i32 = arith.constant 0 : i32
    %c0_i32_0 = arith.constant 0 : i32
    %c0_i32_1 = arith.constant 0 : i32
    return %c0_i32, %c0_i32_0 : i32, i32
  }
  func.func @transform_3(%arg0: i32) -> (i32, i32, i32) {
    %c0_i32 = arith.constant 0 : i32
    %c0_i32_0 = arith.constant 0 : i32
    %c0_i32_1 = arith.constant 0 : i32
    %c0_i32_2 = arith.constant 0 : i32
    return %c0_i32, %c0_i32_0, %c0_i32_1 : i32, i32, i32
  }
  func.func @transform_4(%arg0: i32) -> (i32, i32) {
    %c0_i32 = arith.constant 0 : i32
    %c0_i32_0 = arith.constant 0 : i32
    %c0_i32_1 = arith.constant 0 : i32
    return %c0_i32, %c0_i32_0 : i32, i32
  }
  func.func @transform_5(%arg0: i32) -> (i32, i32) {
    %c0_i32 = arith.constant 0 : i32
    %c0_i32_0 = arith.constant 0 : i32
    %c0_i32_1 = arith.constant 0 : i32
    return %c0_i32, %c0_i32_0 : i32, i32
  }
  func.func @transform_6(%arg0: i32) -> (i32, i32, i32) {
    %c0_i32 = arith.constant 0 : i32
    %c0_i32_0 = arith.constant 0 : i32
    %c0_i32_1 = arith.constant 0 : i32
    %c0_i32_2 = arith.constant 0 : i32
    return %c0_i32, %c0_i32_0, %c0_i32_1 : i32, i32, i32
  }
  func.func @transform_7(%arg0: i32) -> (i32, i32) {
    %c0_i32 = arith.constant 0 : i32
    %c0_i32_0 = arith.constant 0 : i32
    %c0_i32_1 = arith.constant 0 : i32
    return %c0_i32, %c0_i32_0 : i32, i32
  }
  func.func @transform_8(%arg0: i32) -> (i32, i32) {
    %c0_i32 = arith.constant 0 : i32
    %c0_i32_0 = arith.constant 0 : i32
    %c0_i32_1 = arith.constant 0 : i32
    return %c0_i32, %c0_i32_0 : i32, i32
  }
  func.func @transform_9(%arg0: i32) -> (i32, i32, i32) {
    %c0_i32 = arith.constant 0 : i32
    %c0_i32_0 = arith.constant 0 : i32
    %c0_i32_1 = arith.constant 0 : i32
    %c0_i32_2 = arith.constant 0 : i32
    return %c0_i32, %c0_i32_0, %c0_i32_1 : i32, i32, i32
  }
  func.func @transform_10(%arg0: i32) -> (i32, i32, i32) {
    %c0_i32 = arith.constant 0 : i32
    %c0_i32_0 = arith.constant 0 : i32
    %c0_i32_1 = arith.constant 0 : i32
    return %arg0, %c0_i32, %c0_i32_0 : i32, i32, i32
  }
}

</mosaic_0001>

<bundles_post_ra>
// kernel: decoder_forward.1
= control target key start
LH: loop header
LB: loop body
LE: loop exit
PB: predicated region body
PF: predicated region fallthrough
CT: control target
= control target key end

     0   :  { %s2936_s13 = smov 0   ;;  %s3582_s0 = inlined_call_operand.vmem [shape: bf16[2,16,128], index: 0, kind: input, shape index: {}]   ;;  %s3583_s1 = inlined_call_operand.vmem [shape: bf16[128,384], index: 1, kind: input, shape index: {}]   ;;  %s3584_s2 = inlined_call_operand.vmem [shape: f32[16,384], index: 2, kind: input, shape index: {}]   ;;  %s3585_s3 = inlined_call_operand.vmem [shape: bf16[9,8,16], index: 3, kind: input, shape index: {}]   ;;  %s3586_s4 = inlined_call_operand.vmem [shape: f32[8,1], index: 4, kind: input, shape index: {}]   ;;  %s3587_s5 = inlined_call_operand.vmem [shape: f32[8,1], index: 5, kind: input, shape index: {}]   ;;  %s3588_s6 = inlined_call_operand.vmem [shape: bf16[9,8,8], index: 6, kind: input, shape index: {}]   ;;  %s3589_s7 = inlined_call_operand.vmem [shape: f32[8,1], index: 7, kind: input, shape index: {}]   ;;  %s3590_s8 = inlined_call_operand.vmem [shape: f32[8,1], index: 8, kind: input, shape index: {}]   ;;  %s3591_s9 = inlined_call_operand.vmem [shape: bf16[9,1,8], index: 9, kind: input, shape index: {}]   ;;  %s3592_s10 = inlined_call_operand.vmem [shape: f32[2,1,288], index: 10, kind: output, shape index: {}]  }
   0x1 LB: > { %s2585_s14 = sadd.s32 4294967295, %s2868_s13   ;;  %p2589_p0 = scmp.ge.s32.totalorder %s2868_s13, 1  ;;  %s2868_s13 = sphi %s2936_s13, %s20_s13  }
   0x2   : > { %p312_p1 = scmp.lt.s32.totalorder %s2868_s13, 3 }
   0x4   : > { %p313_p2 = pnand %p2589_p0, %p312_p1 }
   0x5   : > { %p349_p3 = scmp.lt.s32.totalorder (!%p313_p2), %s2585_s14, 1  ;;  %s2870_s17 = smov (!%p313_p2), 127  }
   0x6   : > { %316 = sbr.rel (%p313_p2) target bundleno = 1566 (0x61e), region = 60  ;;  %s2871_s20 = smov (!%p313_p2), 126  }
   0x7   : > { %s2872_s21 = smov (!%p313_p2), 110   ;;  %s2873_s22 = smov (!%p313_p2), 109  }
   0x8   : > { %s2874_s23 = smov (!%p313_p2), 92   ;;  %s2876_s25 = smov (!%p313_p2), 91  }
   0x9   : > { %s2877_s26 = smov (!%p313_p2), 90   ;;  %s2879_s29 = smov (!%p313_p2), 19  }
   0xb   : > { %v2682_v0 = vld [vmem:[%s3583_s1 + $0xa8] sm:$0xf]  ;;  %v2826_v1 = vld [vmem:[%s3583_s1 + $0xb0] sm:$0xf0]  ;;  %v2825_v2 = vld [vmem:[%s3583_s1 + $0xac] sm:$0xf] }
   0xc   : > { %v2683_v3 = vor.u32 %v2826_v1, %v2682_v0  ;;  %v2684_v4 = vld [vmem:[%s3583_s1 + $0xb4] sm:$0xf0]  ;;  %v2690_v5 = vld [vmem:[%s3583_s1 + $0xb0] sm:$0xf]  ;;  %v2827_v6 = vld [vmem:[%s3583_s1 + $0xb8] sm:$0xf0] }
   0xd   : > { %v2687_v7 = vor.u32 %v2825_v2, %v2684_v4  ;;  %v2691_v8 = vor.u32 %v2827_v6, %v2690_v5  ;;  %v2670_v9 = vld [vmem:[%s3583_s1 + $0x90] sm:$0xf]  ;;  %v2823_v10 = vld [vmem:[%s3583_s1 + $0x98] sm:$0xf0]  ;;  %v2822_v11 = vld [vmem:[%s3583_s1 + $0x94] sm:$0xf] }
   0xe   : > { %642 = vmatpush.bf16.msra.mxu0 %v2683_v3  ;;  %v2671_v12 = vor.u32 %v2823_v10, %v2670_v9  ;;  %v2672_v13 = vld [vmem:[%s3583_s1 + $0x9c] sm:$0xf0]  ;;  %v2678_v14 = vld [vmem:[%s3583_s1 + $0x98] sm:$0xf]  ;;  %v2824_v15 = vld [vmem:[%s3583_s1 + $0xa0] sm:$0xf0] }
   0xf   : > { %656 = vmatpush.bf16.msra.mxu1 %v2687_v7  ;;  %670 = vmatpush.bf16.msra.mxu2 %v2691_v8  ;;  %v2675_v16 = vor.u32 %v2822_v11, %v2672_v13  ;;  %v2679_v17 = vor.u32 %v2824_v15, %v2678_v14  ;;  %v2658_v18 = vld [vmem:[%s3583_s1 + $0x78] sm:$0xf]  ;;  %v2820_v19 = vld [vmem:[%s3583_s1 + $0x80] sm:$0xf0]  ;;  %v2819_v20 = vld [vmem:[%s3583_s1 + $0x7c] sm:$0xf] }
  0x10   : > { %v2660_v21 = vld [vmem:[%s3583_s1 + $0x84] sm:$0xf0]  ;;  %v2666_v22 = vld [vmem:[%s3583_s1 + $0x80] sm:$0xf]  ;;  %v2821_v23 = vld [vmem:[%s3583_s1 + $0x88] sm:$0xf0]  ;;  %v2659_v24 = vor.u32 %v2820_v19, %v2658_v18 }
  0x11   : > { %v2663_v25 = vor.u32 %v2819_v20, %v2660_v21  ;;  %v2667_v26 = vor.u32 %v2821_v23, %v2666_v22  ;;  %v2646_v27 = vld [vmem:[%s3583_s1 + $0x60] sm:$0xf]  ;;  %v2817_v28 = vld [vmem:[%s3583_s1 + $0x68] sm:$0xf0]  ;;  %v2816_v29 = vld [vmem:[%s3583_s1 + $0x64] sm:$0xf] }
  0x12   : > { %643 = vmatpush.bf16.msra.mxu0 %v2671_v12  ;;  %v2648_v30 = vld [vmem:[%s3583_s1 + $0x6c] sm:$0xf0]  ;;  %v2654_v31 = vld [vmem:[%s3583_s1 + $0x68] sm:$0xf]  ;;  %v2818_v32 = vld [vmem:[%s3583_s1 + $0x70] sm:$0xf0]  ;;  %v2647_v33 = vor.u32 %v2817_v28, %v2646_v27 }
  0x13   : > { %657 = vmatpush.bf16.msra.mxu1 %v2675_v16  ;;  %671 = vmatpush.bf16.msra.mxu2 %v2679_v17  ;;  %v2651_v34 = vor.u32 %v2816_v29, %v2648_v30  ;;  %v2655_v35 = vor.u32 %v2818_v32, %v2654_v31  ;;  %v2634_v36 = vld [vmem:[%s3583_s1 + $0x48] sm:$0xf]  ;;  %v2814_v37 = vld [vmem:[%s3583_s1 + $0x50] sm:$0xf0]  ;;  %v2813_v38 = vld [vmem:[%s3583_s1 + $0x4c] sm:$0xf] }
  0x14   : > { %v2636_v39 = vld [vmem:[%s3583_s1 + $0x54] sm:$0xf0]  ;;  %v2642_v40 = vld [vmem:[%s3583_s1 + $0x50] sm:$0xf]  ;;  %v2815_v41 = vld [vmem:[%s3583_s1 + $0x58] sm:$0xf0]  ;;  %v2635_v42 = vor.u32 %v2814_v37, %v2634_v36 }
  0x15   : > { %v2622_v43 = vld [vmem:[%s3583_s1 + $0x30] sm:$0xf]  ;;  %v2639_v44 = vor.u32 %v2813_v38, %v2636_v39  ;;  %v2643_v45 = vor.u32 %v2815_v41, %v2642_v40  ;;  %v2811_v46 = vld [vmem:[%s3583_s1 + $0x38] sm:$0xf0]  ;;  %v2810_v47 = vld [vmem:[%s3583_s1 + $0x34] sm:$0xf] }
  0x16   : > { %644 = vmatpush.bf16.msra.mxu0 %v2659_v24  ;;  %v2624_v48 = vld [vmem:[%s3583_s1 + $0x3c] sm:$0xf0]  ;;  %v2630_v49 = vld [vmem:[%s3583_s1 + $0x38] sm:$0xf]  ;;  %v2812_v50 = vld [vmem:[%s3583_s1 + $0x40] sm:$0xf0]  ;;  %v2623_v51 = vor.u32 %v2811_v46, %v2622_v43 }
  0x17   : > { %658 = vmatpush.bf16.msra.mxu1 %v2663_v25  ;;  %672 = vmatpush.bf16.msra.mxu2 %v2667_v26  ;;  %v2610_v52 = vld [vmem:[%s3583_s1 + $0x18] sm:$0xf]  ;;  %v2627_v53 = vor.u32 %v2810_v47, %v2624_v48  ;;  %v2631_v54 = vor.u32 %v2812_v50, %v2630_v49  ;;  %v2808_v55 = vld [vmem:[%s3583_s1 + $0x20] sm:$0xf0]  ;;  %v2807_v56 = vld [vmem:[%s3583_s1 + $0x1c] sm:$0xf] }
  0x18   : > { %s3610_s14 = smov (!%p349_p3, %s2585_s14), 1  ;;  %v2612_v57 = vld [vmem:[%s3583_s1 + $0x24] sm:$0xf0]  ;;  %v2618_v58 = vld [vmem:[%s3583_s1 + $0x20] sm:$0xf]  ;;  %v2611_v60 = vor.u32 %v2808_v55, %v2610_v52  ;;  %v505_v13 = vld [vmem:[%s3584_s2 + $0x18] sm:$0xff] }
  0x19   : > { %v2809_v59 = vld [vmem:[%s3583_s1 + $0x28] sm:$0xf0]  ;;  %v2598_v61 = vld [vmem:[%s3583_s1] sm:$0xf]  ;;  %v2615_v62 = vor.u32 %v2807_v56, %v2612_v57  ;;  %v2804_v1 = vld [vmem:[%s3583_s1 + $0x4] sm:$0xf] }
  0x1a   : > { %645 = vmatpush.bf16.msra.mxu0 %v2647_v33  ;;  %v2619_v63 = vor.u32 %v2809_v59, %v2618_v58  ;;  %v2805_v0 = vld [vmem:[%s3583_s1 + $0x8] sm:$0xf0]  ;;  %s2802_s15 = sshll.u32 %s3610_s14, 3  ;;  %v2600_v2 = vld [vmem:[%s3583_s1 + $0xc] sm:$0xf0]  ;;  %v502_v12 = vld [vmem:[%s3584_s2] sm:$0xff] }
  0x1b   : > { %659 = vmatpush.bf16.msra.mxu1 %v2651_v34  ;;  %673 = vmatpush.bf16.msra.mxu2 %v2655_v35  ;;  %v2606_v3 = vld [vmem:[%s3583_s1 + $0x8] sm:$0xf]  ;;  %v2806_v4 = vld [vmem:[%s3583_s1 + $0x10] sm:$0xf0]  ;;  %v2599_v5 = vor.u32 %v2805_v0, %v2598_v61  ;;  %s353_s24 = scalar_lea.vmem %s3582_s0, %s2802_s15  ;;  %v2603_v6 = vor.u32 %v2804_v1, %v2600_v2  ;;  %v506_v15 = vld [vmem:[%s3584_s2 + $0x20] sm:$0xff]  ;;  %vm717_vm0 = vcmask 130048  }
  0x1c   : > { %v2607_v7 = vor.u32 %v2806_v4, %v2606_v3  ;;  %v2803_v8 = vld [vmem:[%s353_s24] sm:$0xff]  ;;  %v503_v11 = vld [vmem:[%s3584_s2 + $0x8] sm:$0xff]  ;;  %v504_v22 = vld [vmem:[%s3584_s2 + $0x10] sm:$0xff]  ;;  %s2875_s24 = smov 108   ;;  %vm810_vm1 = vcmask 1031168   ;;  %vm711_vm2 = vcmask 1039360  }
  0x1d   : > { %v507_v25 = vld [vmem:[%s3584_s2 + $0x28] sm:$0xff]  ;;  %v699_v30 = vld [vmem:[%s3585_s3] sm:$0xf]  ;;  %v2692_v41 = vld [vmem:[%s3585_s3 + $0x4] sm:$0xf]  ;;  %vm869_vm3 = vcmask 900096  }
  0x1e   : > { %646 = vmatpush.bf16.msra.mxu0 %v2635_v42  ;;  %v3150_v35 = vld [vmem:[%s3585_s3 + $0x8] sm:$0xf]  ;;  %v3166_v46 = vld [vmem:[%s3585_s3 + $0xc] sm:$0xf]  ;;  %vm928_vm4 = vcmask 891904   ;;  %vm3594_vm5 = vcmask 883712  }
  0x1f   : > { %660 = vmatpush.bf16.msra.mxu1 %v2639_v44  ;;  %674 = vmatpush.bf16.msra.mxu2 %v2643_v45  ;;  %vm1046_vm6 = vcmask 752640   ;;  %vm3593_vm7 = vcmask 744448   ;;  %v2711_v3 = vld [vmem:[%s3585_s3 + $0x14] sm:$0xf]  ;;  %vm1164_vm8 = vcmask 736256  }
  0x22   : > { %647 = vmatpush.bf16.msra.mxu0 %v2623_v51  ;;  %v3174_v51 = vld [vmem:[%s3585_s3 + $0x10] sm:$0xf] }
  0x23   : > { %661 = vmatpush.bf16.msra.mxu1 %v2627_v53  ;;  %675 = vmatpush.bf16.msra.mxu2 %v2631_v54 }
  0x26   : > { %648 = vmatpush.bf16.msra.mxu0 %v2611_v60 }
  0x27   : > { %662 = vmatpush.bf16.msra.mxu1 %v2615_v62  ;;  %676 = vmatpush.bf16.msra.mxu2 %v2619_v63 }
  0x2a   : > { %649 = vmatpush.bf16.msra.mxu0 %v2599_v5 }
  0x2b   : > { %663 = vmatpush.bf16.msra.mxu1 %v2603_v6  ;;  %677 = vmatpush.bf16.msra.mxu2 %v2607_v7 }
  0x2d   : > { %650 = vmatmul.bf16.vlgmr.msra.gmra.mxu0 %v2803_v8 }
  0x2e   : > { %664 = vmatmul.bf16.vlgmr.msra.gmra.mxu1 %v2803_v8  ;;  %678 = vmatmul.bf16.vlgmr.msra.gmra.mxu2 %v2803_v8 }
  0xaa   : > { %v651_v9 = vpop.f32.mrf.mxu0 }
  0xab   : > { %v665_v10 = vpop.f32.mrf.mxu1  ;;  %v652_v18 = vadd.f32 %v651_v9, %v502_v12 }
  0xac   : > { %v666_v16 = vadd.f32 %v665_v10, %v503_v11  ;;  %v2715_v10 = vld [vmem:[%s3585_s3 + $0x18] sm:$0xf]  ;;  %v2719_v11 = vld [vmem:[%s3585_s3 + $0x1c] sm:$0xf] }
  0xb1   : > { %v679_v14 = vpop.f32.mrf.mxu2 }
  0xb2   : > { %v653_v17 = vpop.f32.mrf.mxu0  ;;  %v680_v26 = vadd.f32 %v679_v14, %v504_v22 }
  0xb3   : > { %v654_v19 = vadd.f32 %v653_v17, %v505_v13  ;;  %v667_v20 = vpop.f32.mrf.mxu1  ;;  %v2723_v13 = vld [vmem:[%s3585_s3 + $0x20] sm:$0xf]  ;;  %v2878_v17 = vmov 0  }
  0xb4   : > { %v668_v21 = vadd.f32 %v667_v20, %v506_v15  ;;  %v1215_v15 = vld [vmem:[%s3586_s4] sm:$0xff]  ;;  %2848 = vset.pattern.permute.xlu0 %v2878_v17  ;;  %2849 = vset.pattern.permute.xlu1 %v2878_v17 }
  0xb5   : > { %v696_v23 = vpack.c.bf16 %v654_v19, %v652_v18 }
  0xb6   : > { %v697_v24 = vpack.c.bf16 %v668_v21, %v666_v16  ;;  %v1224_v16 = vld [vmem:[%s3587_s5] sm:$0xff] }
  0xb7   : > { %705 = vrot.lane.b32.xlu0 %v696_v23, %s2870_s17  ;;  %770 = vmatpush.bf16.msrb.mxu0 %v696_v23 }
  0xb8   : > { %806 = vrot.lane.b32.xlu2 %v697_v24, %s2871_s20  ;;  %783 = vmatpush.bf16.msrb.mxu1 %v697_v24 }
  0xb9   : > { %v681_v27 = vpop.f32.mrf.mxu2 }
  0xba   : > { %v682_v28 = vadd.f32 %v681_v27, %v507_v25  ;;  %2696 = vmatmul.msk.bf16.vlgmr.msrb.gmra.mxu0 %vm717_vm0, %v699_v30 }
  0xbb   : > { %2697 = vmatmul.msk.bf16.vlgmr.msrb.gmra.mxu1 %vm717_vm0, %v699_v30 }
  0xbc   : > { %v698_v29 = vpack.c.bf16 %v682_v28, %v680_v26 }
  0xbe   : > { %709 = vrot.lane.b32.xlu1 %v698_v29, %s2870_s17  ;;  %796 = vmatpush.bf16.msrb.mxu2 %v698_v29 }
  0xbf   : > { %707 = vrot.lane.b32.xlu0 %v697_v24, %s2870_s17 }
  0xc0   : > { %863 = vrot.lane.b32.xlu2 %v696_v23, %s2872_s21 }
  0xc1   : > { %2698 = vmatmul.msk.bf16.vlgmr.msrb.gmra.mxu2 %vm717_vm0, %v699_v30 }
  0xc6   : > { %804 = vrot.lane.b32.xlu1 %v696_v23, %s2871_s20 }
  0xc7   : > { %865 = vrot.lane.b32.xlu0 %v697_v24, %s2872_s21 }
  0xc8   : > { %808 = vrot.lane.b32.xlu2 %v698_v29, %s2871_s20 }
  0xce   : > { %867 = vrot.lane.b32.xlu1 %v698_v29, %s2872_s21 }
  0xcf   : > { %924 = vrot.lane.b32.xlu0 %v697_v24, %s2873_s22 }
  0xd0   : > { %922 = vrot.lane.b32.xlu2 %v696_v23, %s2873_s22 }
  0xd6   : > { %926 = vrot.lane.b32.xlu1 %v698_v29, %s2873_s22 }
  0xd7   : > { %1040 = vrot.lane.b32.xlu0 %v696_v23, %s2874_s23 }
  0xd8   : > { %985 = vrot.lane.b32.xlu2 %v698_v29, %s2875_s24 }
  0xde   : > { %1042 = vrot.lane.b32.xlu1 %v697_v24, %s2874_s23 }
  0xdf   : > { %981 = vrot.lane.b32.xlu0 %v696_v23, %s2875_s24 }
  0xe0   : > { %1099 = vrot.lane.b32.xlu2 %v696_v23, %s2876_s25 }
  0xe6   : > { %983 = vrot.lane.b32.xlu1 %v697_v24, %s2875_s24 }
  0xe7   : > { %1101 = vrot.lane.b32.xlu0 %v697_v24, %s2876_s25 }
  0xe8   : > { %1044 = vrot.lane.b32.xlu2 %v698_v29, %s2874_s23 }
  0xee   : > { %1103 = vrot.lane.b32.xlu1 %v698_v29, %s2876_s25 }
  0xef   : > { %1160 = vrot.lane.b32.xlu0 %v697_v24, %s2877_s26 }
  0xf0   : > { %1158 = vrot.lane.b32.xlu2 %v696_v23, %s2877_s26 }
  0xf6   : > { %1162 = vrot.lane.b32.xlu1 %v698_v29, %s2877_s26 }
  0xf7   : > { %1218 = vperm.xlu0 %2848, %v1215_v15  }
  0xfe   : > { %1227 = vperm.xlu1 %2849, %v1224_v16  }
 0x112   : > { %v807_v31 = vpop.permute.xlu2 %806 }
 0x11a   : > { %v864_v32 = vpop.permute.xlu2 %863 }
 0x122   : > { %v809_v33 = vpop.permute.xlu2 %808 }
 0x123   : > { %v812_v34 = vsel %vm810_vm1, %v807_v31, %v809_v33  ;;  %852 = vmatpush.bf16.msra.mxu1 %v809_v33 }
 0x124   : > { %839 = vmatpush.bf16.msra.mxu0 %v812_v34 }
 0x126   : > { %2702 = vmatmul.msk.bf16.vlgmr.msra.gmra.mxu1 %vm717_vm0, %v3150_v35 }
 0x127   : > { %2701 = vmatmul.msk.bf16.vlgmr.msra.gmra.mxu0 %vm717_vm0, %v3150_v35 }
 0x129   : > { %v706_v36 = vpop.permute.xlu0 %705 }
 0x12a   : > { %v923_v43 = vpop.permute.xlu2 %922 }
 0x130   : > { %v710_v37 = vpop.permute.xlu1 %709 }
 0x131   : > { %v708_v38 = vpop.permute.xlu0 %707 }
 0x132   : > { %v712_v39 = vsel %vm711_vm2, %v706_v36, %v708_v38  ;;  %v713_v40 = vsel %vm711_vm2, %v708_v38, %v710_v37  ;;  %v986_v50 = vpop.permute.xlu2 %985 }
 0x133   : > { %728 = vmatpush.bf16.msra.mxu3 %v712_v39 }
 0x136   : > { %2693 = vmatmul.msk.bf16.vlgmr.msra.gmra.mxu3 %vm717_vm0, %v2692_v41 }
 0x137   : > { %741 = vmatpush.bf16.msrb.mxu3 %v713_v40  ;;  %v772_v18 = vpop.f32.mrf.mxu0 }
 0x138   : > { %v805_v42 = vpop.permute.xlu1 %804  ;;  %v785_v20 = vpop.f32.mrf.mxu1 }
 0x139   : > { %v866_v44 = vpop.permute.xlu0 %865  ;;  %v811_v52 = vsel %vm810_vm1, %v805_v42, %v807_v31 }
 0x13a   : > { %v870_v45 = vsel %vm869_vm3, %v864_v32, %v866_v44  ;;  %v1100_v56 = vpop.permute.xlu2 %1099 }
 0x13b   : > { %754 = vmatpush.bf16.msra.mxu3 %v710_v37  ;;  %885 = vmatpush.bf16.msra.mxu2 %v870_v45 }
 0x13e   : > { %2704 = vmatmul.msk.bf16.vlgmr.msra.gmra.mxu2 %vm717_vm0, %v3166_v46 }
 0x13f   : > { %v774_v19 = vpop.f32.mrf.mxu0 }
 0x140   : > { %v868_v47 = vpop.permute.xlu1 %867  ;;  %v787_v22 = vpop.f32.mrf.mxu1 }
 0x141   : > { %911 = vmatpush.bf16.msrb.mxu0 %v868_v47  ;;  %v925_v48 = vpop.permute.xlu0 %924  ;;  %v871_v59 = vsel %vm869_vm3, %v866_v44, %v868_v47 }
 0x142   : > { %v929_v49 = vsel %vm928_vm4, %v923_v43, %v925_v48  ;;  %v1045_v60 = vpop.permute.xlu2 %1044 }
 0x143   : > { %944 = vmatpush.bf16.msrb.mxu1 %v929_v49 }
 0x144   : > { %2706 = vmatmul.msk.bf16.vlgmr.msrb.gmra.mxu0 %vm717_vm0, %v3166_v46  ;;  %v798_v26 = vpop.f32.mrf.mxu2 }
 0x146   : > { %2694 = vmatmul.msk.bf16.vlgmr.msrb.gmra.mxu3 %vm717_vm0, %v2692_v41  ;;  %2708 = vmatmul.msk.bf16.vlgmr.msrb.gmra.mxu1 %vm717_vm0, %v3174_v51 }
 0x147   : > { %826 = vmatpush.bf16.msrb.mxu3 %v811_v52 }
 0x148   : > { %v927_v53 = vpop.permute.xlu1 %926 }
 0x149   : > { %v930_v54 = vsel %vm928_vm4, %v925_v48, %v927_v53  ;;  %v1041_v55 = vpop.permute.xlu0 %1040 }
 0x14a   : > { %957 = vmatpush.bf16.msrb.mxu2 %v930_v54  ;;  %v1159_v5 = vpop.permute.xlu2 %1158 }
 0x14c   : > { %v800_v30 = vpop.f32.mrf.mxu2 }
 0x14e   : > { %1029 = vmatpush.bf16.msra.mxu2 %v986_v50 }
 0x14f   : > { %2709 = vmatmul.msk.bf16.vlgmr.msrb.gmra.mxu2 %vm717_vm0, %v3174_v51 }
 0x150   : > { %v1043_v57 = vpop.permute.xlu1 %1042 }
 0x151   : > { %v982_v58 = vpop.permute.xlu0 %981  ;;  %v1048_v1 = vsel %vm1046_vm6, %v1043_v57, %v1045_v60  ;;  %v1047_v12 = vsel %vm1046_vm6, %v1041_v55, %v1043_v57 }
 0x156   : > { %2695 = vmatmul.msk.bf16.vlgmr.msra.gmra.mxu3 %vm717_vm0, %v2692_v41 }
 0x157   : > { %898 = vmatpush.bf16.msra.mxu3 %v871_v59 }
 0x158   : > { %v984_v61 = vpop.permute.xlu1 %983 }
 0x159   : > { %v988_v62 = vsel %vm3594_vm5, %v982_v58, %v984_v61  ;;  %v989_v63 = vsel %vm3594_vm5, %v984_v61, %v986_v50  ;;  %v1102_v0 = vpop.permute.xlu0 %1101 }
 0x15a   : > { %1016 = vmatpush.bf16.msra.mxu1 %v989_v63  ;;  %v1106_v2 = vsel %vm3593_vm7, %v1100_v56, %v1102_v0  ;;  %1003 = vmatpush.bf16.msra.mxu0 %v988_v62 }
 0x15b   : > { %1121 = vmatpush.bf16.msrb.mxu2 %v1106_v2 }
 0x15d   : > { %2712 = vmatmul.msk.bf16.vlgmr.msra.gmra.mxu0 %vm717_vm0, %v2711_v3  ;;  %2713 = vmatmul.msk.bf16.vlgmr.msra.gmra.mxu1 %vm717_vm0, %v2711_v3 }
 0x15e   : > { %1075 = vmatpush.bf16.msrb.mxu0 %v1048_v1  ;;  %1088 = vmatpush.bf16.msrb.mxu1 %v1045_v60 }
 0x15f   : > { %2714 = vmatmul.msk.bf16.vlgmr.msra.gmra.mxu2 %vm717_vm0, %v2711_v3 }
 0x160   : > { %v1104_v4 = vpop.permute.xlu1 %1103 }
 0x161   : > { %v1161_v6 = vpop.permute.xlu0 %1160  ;;  %v1107_v14 = vsel %vm3593_vm7, %v1102_v0, %v1104_v4  ;;  %v359_v0 = vlaneseq }
 0x162   : > { %1147 = vmatpush.bf16.msra.mxu0 %v1104_v4  ;;  %v1165_v7 = vsel %vm1164_vm8, %v1159_v5, %v1161_v6 }
 0x163   : > { %1180 = vmatpush.bf16.msra.mxu1 %v1165_v7  ;;  %v3238_v1 = vand.u32 127, %v359_v0 }
 0x166   : > { %2700 = vmatmul.msk.bf16.vlgmr.msrb.gmra.mxu3 %vm717_vm0, %v3150_v35 }
 0x167   : > { %970 = vmatpush.bf16.msrb.mxu3 %v927_v53 }
 0x168   : > { %v1163_v8 = vpop.permute.xlu1 %1162 }
 0x169   : > { %v1166_v9 = vsel %vm1164_vm8, %v1161_v6, %v1163_v8  ;;  %v3245_v6 = vadd.s32 128, %v3238_v1 }
 0x16a   : > { %1193 = vmatpush.bf16.msra.mxu2 %v1166_v9 }
 0x16b   : > { %v395_v9 = vand.u32 65535, %v3245_v6 }
 0x16d   : > { %2717 = vmatmul.msk.bf16.vlgmr.msrb.gmra.mxu0 %vm717_vm0, %v2715_v10  ;;  %2718 = vmatmul.msk.bf16.vlgmr.msrb.gmra.mxu1 %vm717_vm0, %v2715_v10 }
 0x16f   : > { %2720 = vmatmul.msk.bf16.vlgmr.msrb.gmra.mxu2 %vm717_vm0, %v2719_v11 }
 0x176   : > { %2705 = vmatmul.msk.bf16.vlgmr.msra.gmra.mxu3 %vm717_vm0, %v3166_v46 }
 0x177   : > { %1062 = vmatpush.bf16.msra.mxu3 %v1047_v12  ;;  %v399_v12 = vmul.u32 58254, %v395_v9 }
 0x17d   : > { %2722 = vmatmul.msk.bf16.vlgmr.msra.gmra.mxu0 %vm717_vm0, %v2719_v11  ;;  %2724 = vmatmul.msk.bf16.vlgmr.msra.gmra.mxu1 %vm717_vm0, %v2723_v13 }
 0x17f   : > { %2725 = vmatmul.msk.bf16.vlgmr.msra.gmra.mxu2 %vm717_vm0, %v2723_v13 }
 0x186   : > { %2710 = vmatmul.msk.bf16.vlgmr.msrb.gmra.mxu3 %vm717_vm0, %v3174_v51 }
 0x187   : > { %1134 = vmatpush.bf16.msrb.mxu3 %v1107_v14  ;;  %v366_v14 = vand.u32 65535, %v3238_v1 }
 0x189   : > { %v370_v22 = vmul.u32 58254, %v366_v14 }
 0x18b   : > { %v373_v30 = vshll.u32 %v370_v22, 16 }
 0x196   : > { %2716 = vmatmul.msk.bf16.vlgmr.msra.gmra.mxu3 %vm717_vm0, %v2715_v10 }
 0x197   : > { %1206 = vmatpush.bf16.msra.mxu3 %v1163_v8 }
 0x1a3   : > { %v854_v27 = vpop.f32.mrf.mxu1 }
 0x1a4   : > { %v841_v21 = vpop.f32.mrf.mxu0 }
 0x1a6   : > { %2721 = vmatmul.msk.bf16.vlgmr.msrb.gmra.mxu3 %vm717_vm0, %v2719_v11  ;;  %v396_v11 = vshrl.u32 %v3245_v6, 16 }
 0x1a8   : > { %v400_v19 = vmul.u32 14564, %v396_v11 }
 0x1ab   : > { %v856_v31 = vpop.f32.mrf.mxu1 }
 0x1ac   : > { %v843_v23 = vpop.f32.mrf.mxu0 }
 0x1ad   : > { %v404_v23 = vshll.u32 %v400_v19, 16 }
 0x1b6   : > { %2726 = vmatmul.msk.bf16.vlgmr.msra.gmra.mxu3 %vm717_vm0, %v2723_v13 }
 0x1b9   : > { %v730_v24 = vpop.f32.mrf.mxu3 }
 0x1ba   : > { %v773_v25 = vadd.f32 %v772_v18, %v730_v24  ;;  %v398_v18 = vmul.u32 14564, %v395_v9 }
 0x1c1   : > { %v732_v28 = vpop.f32.mrf.mxu3  ;;  %v913_v29 = vpop.f32.mrf.mxu0 }
 0x1c2   : > { %v887_v35 = vpop.f32.mrf.mxu2  ;;  %v401_v28 = vmul.u32 58254, %v396_v11 }
 0x1c3   : > { %v946_v37 = vpop.f32.mrf.mxu1 }
 0x1c9   : > { %v743_v32 = vpop.f32.mrf.mxu3  ;;  %v915_v33 = vpop.f32.mrf.mxu0 }
 0x1ca   : > { %v786_v34 = vadd.f32 %v785_v20, %v743_v32  ;;  %v889_v39 = vpop.f32.mrf.mxu2  ;;  %v402_v20 = vshll.u32 %v399_v12, 16 }
 0x1cb   : > { %v948_v40 = vpop.f32.mrf.mxu1 }
 0x1cc   : > { %v859_v36 = vadd.f32 %v841_v21, %v786_v34  ;;  %vm406_vm9 = vc.u32 %v398_v18, %v402_v20  ;;  %v408_v24 = vadd.s32 %v402_v20, %v398_v18 }
 0x1cd   : > { %v407_v33 = vsel %vm406_vm9, 1, %v2878_v17 }
 0x1ce   : > { %vm410_vm10 = vc.u32 %v408_v24, %v404_v23 }
 0x1d1   : > { %v745_v38 = vpop.f32.mrf.mxu3 }
 0x1d2   : > { %v959_v44 = vpop.f32.mrf.mxu2 }
 0x1d9   : > { %v756_v41 = vpop.f32.mrf.mxu3 }
 0x1da   : > { %v799_v42 = vadd.f32 %v798_v26, %v756_v41  ;;  %v1005_v43 = vpop.f32.mrf.mxu0  ;;  %v1018_v46 = vpop.f32.mrf.mxu1  ;;  %v3256_v26 = vadd.s32 256, %v3238_v1  ;;  %v411_v41 = vsel %vm410_vm10, 1, %v2878_v17 }
 0x1db   : > { %v961_v50 = vpop.f32.mrf.mxu2 }
 0x1dc   : > { %v860_v45 = vadd.f32 %v854_v27, %v799_v42  ;;  %v424_v34 = vand.u32 65535, %v3256_v26  ;;  %v425_v38 = vshrl.u32 %v3256_v26, 16 }
 0x1de   : > { %v919_v47 = vadd.f32 %v913_v29, %v860_v45  ;;  %v369_v29 = vmul.u32 14564, %v366_v14  ;;  %v428_v39 = vmul.u32 58254, %v424_v34  ;;  %v429_v50 = vmul.u32 14564, %v425_v38 }
 0x1e0   : > { %vm377_vm11 = vc.u32 %v369_v29, %v373_v30  ;;  %v434_v23 = vshrl.u32 %v429_v50, 16 }
 0x1e1   : > { %v758_v48 = vpop.f32.mrf.mxu3 }
 0x1e2   : > { %v1007_v49 = vpop.f32.mrf.mxu0  ;;  %v1020_v51 = vpop.f32.mrf.mxu1 }
 0x1e3   : > { %v1031_v55 = vpop.f32.mrf.mxu2  ;;  %v427_v49 = vmul.u32 14564, %v424_v34  ;;  %v431_v51 = vshll.u32 %v428_v39, 16  ;;  %v1219_v34 = vpop.permute.xlu0 %1218 }
 0x1e5   : > { %vm435_vm13 = vc.u32 %v427_v49, %v431_v51 }
 0x1e9   : > { %v828_v52 = vpop.f32.mrf.mxu3 }
 0x1ea   : > { %v858_v53 = vadd.f32 %v828_v52, %v773_v25  ;;  %v3233_v54 = vpop.f32.mrf.mxu0  ;;  %v1090_v57 = vpop.f32.mrf.mxu1  ;;  %v367_v25 = vshrl.u32 %v3238_v1, 16 }
 0x1eb   : > { %v1033_v62 = vpop.f32.mrf.mxu2 }
 0x1ec   : > { %v917_v56 = vadd.f32 %v887_v35, %v858_v53  ;;  %v371_v35 = vmul.u32 14564, %v367_v25  ;;  %v372_v45 = vmul.u32 58254, %v367_v25  ;;  %v405_v53 = vshrl.u32 %v400_v19, 16 }
 0x1ed   : > { %v436_v62 = vsel %vm435_vm13, 1, %v2878_v17 }
 0x1ee   : > { %v976_v58 = vadd.f32 %v946_v37, %v917_v56  ;;  %v409_v37 = vadd.s32 %v407_v33, %v401_v28  ;;  %v375_v42 = vshll.u32 %v371_v35, 16 }
 0x1f0   : > { %v3235_v59 = vadd.f32 %v1005_v43, %v976_v58  ;;  %v379_v43 = vadd.s32 %v373_v30, %v369_v29  ;;  %v413_v48 = vadd.s32 %v411_v41, %v409_v37  ;;  %v437_v58 = vadd.s32 %v431_v51, %v427_v49 }
 0x1f1   : > { %v830_v60 = vpop.f32.mrf.mxu3 }
 0x1f2   : > { %v1079_v61 = vpop.f32.mrf.mxu0  ;;  %v1092_v63 = vpop.f32.mrf.mxu1  ;;  %vm381_vm12 = vc.u32 %v379_v43, %v375_v42 }
 0x1f3   : > { %v3242_v5 = vpop.f32.mrf.mxu2  ;;  %v382_v60 = vsel %vm381_vm12, 1, %v2878_v17  ;;  %v430_v61 = vmul.u32 58254, %v425_v38  ;;  %v1228_v38 = vpop.permute.xlu1 %1227 }
 0x1f5   : > { %v438_v9 = vadd.s32 %v436_v62, %v430_v61  ;;  %v2880_v62 = vmov 0.0  }
 0x1f6   : > { %1245 = vst [vmem:[#allocation3] sm:$0xff] %v2880_v62 }
 0x1f7   : > { %1247 = vst [vmem:[#allocation3 + $0x10] sm:$0xff] %v2880_v62 }
 0x1f8   : > { %1870 = vst [vmem:[#allocation4] sm:$0xff] %v2880_v62 }
 0x1f9   : > { %v900_v2 = vpop.f32.mrf.mxu3  ;;  %1872 = vst [vmem:[#allocation4 + $0x10] sm:$0xff] %v2880_v62 }
 0x1fa   : > { %v918_v3 = vadd.f32 %v900_v2, %v859_v36  ;;  %v3240_v4 = vpop.f32.mrf.mxu0  ;;  %v3247_v8 = vpop.f32.mrf.mxu1 }
 0x1fb   : > { %v1125_v15 = vpop.f32.mrf.mxu2 }
 0x1fc   : > { %v977_v7 = vadd.f32 %v959_v44, %v918_v3  ;;  %v403_v44 = vshrl.u32 %v399_v12, 16  ;;  %v374_v3 = vshrl.u32 %v370_v22, 16  ;;  %v432_v15 = vshrl.u32 %v428_v39, 16 }
 0x1fe   : > { %v3250_v10 = vadd.f32 %v1018_v46, %v977_v7  ;;  %v378_v46 = vsel %vm377_vm11, 1, %v2878_v17  ;;  %v414_v56 = vadd.s32 %v413_v48, %v403_v44 }
 0x200   : > { %v415_v2 = vadd.s32 %v414_v56, %v405_v53 }
 0x201   : > { %v902_v13 = vpop.f32.mrf.mxu3 }
 0x202   : > { %v1151_v16 = vpop.f32.mrf.mxu0  ;;  %v1184_v21 = vpop.f32.mrf.mxu1  ;;  %v416_v12 = vshrl.u32 %v415_v2, 4  ;;  %v376_v13 = vshrl.u32 %v371_v35, 16 }
 0x203   : > { %v3258_v32 = vpop.f32.mrf.mxu2 }
 0x204   : > { %v417_v19 = vmul.u32 18, %v416_v12 }
 0x206   : > { %v418_v25 = vsub.s32 %v3245_v6, %v417_v19  ;;  %v1840_v19 = vld [vmem:[%s3589_s7] sm:$0xff] }
 0x208   : > { %vm451_vm15 = vcmp.ne.s32.totalorder %v418_v25, 0  ;;  %vm454_vm0 = vcmp.lt.s32.totalorder %v418_v25, 0 }
 0x209   : > { %v972_v27 = vpop.f32.mrf.mxu3  ;;  %vm457_vm9 = vmand %vm454_vm0, %vm451_vm15 }
 0x20a   : > { %v978_v31 = vadd.f32 %v972_v27, %v919_v47 }
 0x20b   : > { %v1197_v52 = vpop.f32.mrf.mxu2 }
 0x20c   : > { %v1037_v36 = vadd.f32 %v1031_v55, %v978_v31  ;;  %v380_v55 = vadd.s32 %v378_v46, %v372_v45 }
 0x20e   : > { %v3263_v40 = vadd.f32 %v1090_v57, %v1037_v36  ;;  %v433_v57 = vshll.u32 %v429_v50, 16  ;;  %v384_v7 = vadd.s32 %v382_v60, %v380_v55 }
 0x210   : > { %vm439_vm14 = vc.u32 %v437_v58, %v433_v57  ;;  %v385_v14 = vadd.s32 %v384_v7, %v374_v3  ;;  %v1155_v48 = vadd.f32 %v3240_v4, %v3263_v40 }
 0x211   : > { %v974_v47 = vpop.f32.mrf.mxu3  ;;  %v440_v11 = vsel %vm439_vm14, 1, %v2878_v17  ;;  %v1095_v17 = vadd.f32 %v3233_v54, %v3250_v10 }
 0x212   : > { %v442_v16 = vadd.s32 %v440_v11, %v438_v9  ;;  %v386_v20 = vadd.s32 %v385_v14, %v376_v13 }
 0x214   : > { %v443_v24 = vadd.s32 %v442_v16, %v432_v15  ;;  %v387_v22 = vshrl.u32 %v386_v20, 4  ;;  %v1274_v20 = vld [vmem:[%s3588_s6] sm:$0xf] }
 0x216   : > { %v444_v28 = vadd.s32 %v443_v24, %v434_v23  ;;  %v388_v30 = vmul.u32 18, %v387_v22 }
 0x218   : > { %v445_v35 = vshrl.u32 %v444_v28, 4  ;;  %v389_v6 = vsub.s32 %v3238_v1, %v388_v30 }
 0x219   : > { %v1064_v63 = vpop.f32.mrf.mxu3 }
 0x21a   : > { %v1094_v21 = vadd.f32 %v1064_v63, %v3235_v59  ;;  %v460_v59 = vadd.s32 18, %v418_v25  ;;  %v446_v54 = vmul.u32 18, %v445_v35  ;;  %vm450_vm10 = vcmp.ne.s32.totalorder %v389_v6, 0 }
 0x21b   : > { %vm453_vm11 = vcmp.lt.s32.totalorder %v389_v6, 0 }
 0x21c   : > { %v1153_v27 = vadd.f32 %v3242_v5, %v1094_v21  ;;  %v463_v39 = vsel %vm457_vm9, %v460_v59, %v418_v25  ;;  %v447_v44 = vsub.s32 %v3256_v26, %v446_v54  ;;  %vm456_vm14 = vmand %vm453_vm11, %vm450_vm10 }
 0x21d   : > { %vm3278_vm12 = vcmp.lt.s32.totalorder %v463_v39, 16  ;;  %v2738_v39 = vld [vmem:[%s3588_s6 + $0xc] sm:$0xf] }
 0x21e   : > { %v1212_v31 = vadd.f32 %v3247_v8, %v1153_v27  ;;  %vm452_vm0 = vcmp.ne.s32.totalorder %v447_v44, 0  ;;  %vm455_vm9 = vcmp.lt.s32.totalorder %v447_v44, 0  ;;  %v461_v50 = vadd.s32 18, %v447_v44  ;;  %v2727_v27 = vld [vmem:[%s3588_s6 + $0x4] sm:$0xf] }
 0x21f   : > { %vm458_vm10 = vmand %vm455_vm9, %vm452_vm0  ;;  %vm1292_vm0 = vcmask 1043456   ;;  %vm1266_vm9 = vcmask 416768  }
 0x220   : > { %v1221_v5 = vmul.f32 %v1219_v34, %v1212_v31  ;;  %v464_v56 = vsel %vm458_vm10, %v461_v50, %v447_v44  ;;  %vm1288_vm10 = vcmask 64512  }
 0x221   : > { %v1066_v18 = vpop.f32.mrf.mxu3  ;;  %vm3295_vm11 = vcmp.lt.s32.totalorder %v464_v56, 16 }
 0x222   : > { %v1230_v42 = vadd.f32 %v1228_v38, %v1221_v5  ;;  %v1849_v18 = vld [vmem:[%s3590_s8] sm:$0xff] }
 0x224   : > { %v1236_v46 = vmul.f32 0.01, %v1230_v42  ;;  %vm1233_vm15 = vcmp.ge.f32.partialorder %v1230_v42, 0.0 }
 0x226   : > { %v1239_v52 = vsel %vm1233_vm15, %v1230_v42, %v1236_v46  ;;  %vm1263_vm15 = vcmask 1047704  }
 0x229   : > { %v1136_v29 = vpop.f32.mrf.mxu3 }
 0x22a   : > { %v1154_v33 = vadd.f32 %v1136_v29, %v1095_v17 }
 0x22c   : > { %v1213_v36 = vadd.f32 %v3258_v32, %v1154_v33  ;;  %v459_v32 = vadd.s32 18, %v389_v6  ;;  %v2734_v33 = vld [vmem:[%s3588_s6 + $0x8] sm:$0xf] }
 0x22e   : > { %v1222_v37 = vmul.f32 %v1219_v34, %v1213_v36  ;;  %v462_v47 = vsel %vm456_vm14, %v459_v32, %v389_v6  ;;  %vm1257_vm14 = vcmask 154624  }
 0x22f   : > { %vm3288_vm7 = vcmp.lt.s32.totalorder %v462_v47, 16 }
 0x230   : > { %v1231_v10 = vadd.f32 %v1228_v38, %v1222_v37  ;;  %v1242_v55 = vsel %vm3288_vm7, %v1239_v52, 0.0  ;;  %v2742_v52 = vld [vmem:[%s3588_s6 + $0x10] sm:$0xf] }
 0x231   : > { %v1138_v41 = vpop.f32.mrf.mxu3 }
 0x232   : > { %vm1234_vm13 = vcmp.ge.f32.partialorder %v1231_v10, 0.0  ;;  %v1237_v43 = vmul.f32 0.01, %v1231_v10 }
 0x234   : > { %v1240_v1 = vsel %vm1234_vm13, %v1231_v10, %v1237_v43 }
 0x235   : > { %v1243_v45 = vsel %vm3278_vm12, %v1240_v1, 0.0 }
 0x236   : > { %1253 = vrot.lane.b32.xlu2 %v1243_v45, %s2879_s29 }
 0x239   : > { %v1208_v49 = vpop.f32.mrf.mxu3 }
 0x23a   : > { %v1214_v51 = vadd.f32 %v1208_v49, %v1155_v48 }
 0x23c   : > { %v1223_v53 = vmul.f32 %v1219_v34, %v1214_v51 }
 0x23e   : > { %v1232_v57 = vadd.f32 %v1228_v38, %v1223_v53  ;;  %1251 = vrot.lane.b32.xlu2 %v1242_v55, %s2879_s29 }
 0x240   : > { %vm1235_vm13 = vcmp.ge.f32.partialorder %v1232_v57, 0.0  ;;  %v1238_v4 = vmul.f32 0.01, %v1232_v57 }
 0x241   : > { %v1210_v40 = vpop.f32.mrf.mxu3 }
 0x242   : > { %v1241_v60 = vsel %vm1235_vm13, %v1232_v57, %v1238_v4  ;;  %vm3601_vm13 = vcmask 744448  }
 0x243   : > { %v1244_v61 = vsel %vm3295_vm11, %v1241_v60, 0.0 }
 0x244   : > { %1255 = vrot.lane.b32.xlu1 %v1244_v61, %s2879_s29 }
 0x290   : > { %v1254_v63 = vpop.permute.xlu2 %1253 }
 0x298   : > { %v1252_v2 = vpop.permute.xlu2 %1251 }
 0x299   : > { %v1258_v3 = vsel %vm1257_vm14, %v1252_v2, %v1254_v63  ;;  %1264 = vst.msk [vmem:[#allocation3] sm:$0xff] %vm1263_vm15, %v1252_v2 }
 0x29a   : > { %v1272_v7 = vpack.c.bf16 %v1258_v3, %v1258_v3 }
 0x29c   : > { %1282 = vrot.lane.b32.xlu2 %v1272_v7, %s2870_s17  ;;  %v1348_v22 = vsel %vm1292_vm0, %v1272_v7, 0 }
 0x2a0   : > { %v1268_v9 = vld [vmem:[#allocation3] sm:$0xff] }
 0x2a1   : > { %v1271_v11 = vpack.c.bf16 %v1268_v9, %v1268_v9  ;;  %v2746_v9 = vld [vmem:[%s3588_s6 + $0x14] sm:$0xf] }
 0x2a3   : > { %1280 = vrot.lane.b32.xlu1 %v1271_v11, %s2870_s17  ;;  %v1345_v12 = vsel %vm1292_vm0, %v1271_v11, 0 }
 0x2a4   : > { %1360 = vmatpush.bf16.msrb.mxu3 %v1345_v12 }
 0x2a7   : > { %2731 = vmatmul.msk.bf16.vlgmr.msrb.gmra.mxu3 %vm1288_vm10, %v1274_v20 }
 0x2ab   : > { %1396 = vrot.lane.b32.xlu1 %v1272_v7, %s2871_s20 }
 0x2b6   : > { %v1256_v13 = vpop.permute.xlu1 %1255 }
 0x2b7   : > { %v1259_v14 = vsel %vm1257_vm14, %v1254_v63, %v1256_v13 }
 0x2b8   : > { %1267 = vst.msk [vmem:[#allocation3 + $0x10] sm:$0xff] %vm1266_vm9, %v1259_v14 }
 0x2bf   : > { %v1270_v15 = vld [vmem:[#allocation3 + $0x10] sm:$0xff] }
 0x2c0   : > { %v1273_v16 = vpack.c.bf16 %v1270_v15, %v1270_v15 }
 0x2c2   : > { %1284 = vrot.lane.b32.xlu0 %v1273_v16, %s2870_s17  ;;  %1462 = vrot.lane.b32.xlu1 %v1273_v16, %s2872_s21  ;;  %v1351_v54 = vsel %vm1292_vm0, %v1273_v16, 0 }
 0x2c3   : > { %1398 = vrot.lane.b32.xlu2 %v1273_v16, %s2871_s20 }
 0x2ca   : > { %1394 = vrot.lane.b32.xlu0 %v1271_v11, %s2871_s20  ;;  %1522 = vrot.lane.b32.xlu1 %v1271_v11, %s2873_s22 }
 0x2cb   : > { %1458 = vrot.lane.b32.xlu2 %v1271_v11, %s2872_s21 }
 0x2d2   : > { %1460 = vrot.lane.b32.xlu0 %v1272_v7, %s2872_s21  ;;  %1588 = vrot.lane.b32.xlu1 %v1272_v7, %s2875_s24 }
 0x2d3   : > { %1524 = vrot.lane.b32.xlu2 %v1272_v7, %s2873_s22 }
 0x2da   : > { %1526 = vrot.lane.b32.xlu0 %v1273_v16, %s2873_s22  ;;  %1590 = vrot.lane.b32.xlu1 %v1273_v16, %s2875_s24 }
 0x2db   : > { %1650 = vrot.lane.b32.xlu2 %v1271_v11, %s2874_s23 }
 0x2e2   : > { %1586 = vrot.lane.b32.xlu0 %v1271_v11, %s2875_s24  ;;  %1718 = vrot.lane.b32.xlu1 %v1273_v16, %s2876_s25 }
 0x2e3   : > { %1654 = vrot.lane.b32.xlu2 %v1273_v16, %s2874_s23 }
 0x2ea   : > { %1652 = vrot.lane.b32.xlu0 %v1272_v7, %s2874_s23  ;;  %1778 = vrot.lane.b32.xlu1 %v1271_v11, %s2877_s26 }
 0x2eb   : > { %1714 = vrot.lane.b32.xlu2 %v1271_v11, %s2876_s25 }
 0x2f2   : > { %1716 = vrot.lane.b32.xlu0 %v1272_v7, %s2876_s25  ;;  %1852 = vperm.xlu1 %2849, %v1849_v18  }
 0x2f3   : > { %1780 = vrot.lane.b32.xlu2 %v1272_v7, %s2877_s26 }
 0x2f6   : > { %v1283_v21 = vpop.permute.xlu2 %1282 }
 0x2fa   : > { %1782 = vrot.lane.b32.xlu0 %v1273_v16, %s2877_s26 }
 0x302   : > { %1843 = vperm.xlu0 %2848, %v1840_v19  }
 0x315   : > { %v1281_v23 = vpop.permute.xlu1 %1280 }
 0x316   : > { %v1286_v24 = vsel %vm711_vm2, %v1281_v23, %v1283_v21 }
 0x317   : > { %v1294_v25 = vsel %vm1292_vm0, %v1286_v24, 0 }
 0x318   : > { %1309 = vmatpush.bf16.msrb.mxu0 %v1294_v25 }
 0x31b   : > { %2728 = vmatmul.msk.bf16.vlgmr.msrb.gmra.mxu0 %vm1288_vm10, %v2727_v27 }
 0x31c   : > { %1373 = vmatpush.bf16.msra.mxu0 %v1348_v22 }
 0x31d   : > { %v1399_v28 = vpop.permute.xlu2 %1398  ;;  %v1397_v17 = vpop.permute.xlu1 %1396 }
 0x31e   : > { %v1412_v29 = vsel %vm1292_vm0, %v1399_v28, 0  ;;  %v1401_v30 = vsel %vm810_vm1, %v1397_v17, %v1399_v28 }
 0x31f   : > { %v1409_v31 = vsel %vm1292_vm0, %v1401_v30, 0 }
 0x320   : > { %1447 = vmatpush.bf16.msrb.mxu0 %v1412_v29  ;;  %1434 = vmatpush.bf16.msra.mxu3 %v1409_v31  ;;  %v2754_v31 = vld [vmem:[%s3588_s6 + $0x1c] sm:$0xf] }
 0x323   : > { %2736 = vmatmul.msk.bf16.vlgmr.msra.gmra.mxu3 %vm1288_vm10, %v2734_v33 }
 0x325   : > { %v1459_v34 = vpop.permute.xlu2 %1458 }
 0x32b   : > { %2732 = vmatmul.msk.bf16.vlgmr.msra.gmra.mxu0 %vm1288_vm10, %v1274_v20 }
 0x32d   : > { %v1525_v59 = vpop.permute.xlu2 %1524 }
 0x334   : > { %v1285_v35 = vpop.permute.xlu0 %1284  ;;  %v1463_v36 = vpop.permute.xlu1 %1462 }
 0x335   : > { %v1287_v6 = vsel %vm711_vm2, %v1283_v21, %v1285_v35  ;;  %v1300_v5 = vsel %vm1292_vm0, %v1285_v35, 0  ;;  %v1476_v37 = vsel %vm1292_vm0, %v1463_v36, 0  ;;  %v1651_v42 = vpop.permute.xlu2 %1650  ;;  %v1362_v35 = vpop.f32.mrf.mxu3 }
 0x336   : > { %v1297_v38 = vsel %vm1292_vm0, %v1287_v6, 0  ;;  %1335 = vmatpush.bf16.msrb.mxu2 %v1300_v5  ;;  %1511 = vmatpush.bf16.msrb.mxu3 %v1476_v37 }
 0x337   : > { %1322 = vmatpush.bf16.msrb.mxu1 %v1297_v38 }
 0x339   : > { %2730 = vmatmul.msk.bf16.vlgmr.msrb.gmra.mxu2 %vm1288_vm10, %v2727_v27  ;;  %2741 = vmatmul.msk.bf16.vlgmr.msrb.gmra.mxu3 %vm1288_vm10, %v2738_v39 }
 0x33a   : > { %2729 = vmatmul.msk.bf16.vlgmr.msrb.gmra.mxu1 %vm1288_vm10, %v2727_v27  ;;  %v2750_v27 = vld [vmem:[%s3588_s6 + $0x18] sm:$0xf] }
 0x33b   : > { %1386 = vmatpush.bf16.msra.mxu1 %v1351_v54  ;;  %2737 = vmatmul.msk.bf16.vlgmr.msrb.gmra.mxu0 %vm1288_vm10, %v2734_v33 }
 0x33c   : > { %v1395_v10 = vpop.permute.xlu0 %1394  ;;  %v1523_v41 = vpop.permute.xlu1 %1522 }
 0x33d   : > { %v1400_v43 = vsel %vm810_vm1, %v1395_v10, %v1397_v17  ;;  %v1528_v32 = vsel %vm928_vm4, %v1523_v41, %v1525_v59  ;;  %v1655_v51 = vpop.permute.xlu2 %1654 }
 0x33e   : > { %v1406_v44 = vsel %vm1292_vm0, %v1400_v43, 0  ;;  %v1534_v1 = vsel %vm1292_vm0, %v1528_v32, 0  ;;  %v1668_v61 = vsel %vm1292_vm0, %v1655_v51, 0 }
 0x33f   : > { %1421 = vmatpush.bf16.msra.mxu2 %v1406_v44  ;;  %1549 = vmatpush.bf16.msra.mxu0 %v1534_v1 }
 0x344   : > { %v1461_v45 = vpop.permute.xlu0 %1460  ;;  %v1589_v46 = vpop.permute.xlu1 %1588 }
 0x345   : > { %v1464_v47 = vsel %vm869_vm3, %v1459_v34, %v1461_v45  ;;  %v1465_v48 = vsel %vm869_vm3, %v1461_v45, %v1463_v36  ;;  %v1715_v62 = vpop.permute.xlu2 %1714  ;;  %v2758_v34 = vld [vmem:[%s3588_s6 + $0x20] sm:$0xf]  ;;  %v1364_v36 = vpop.f32.mrf.mxu3 }
 0x346   : > { %v1470_v49 = vsel %vm1292_vm0, %v1464_v47, 0  ;;  %v1473_v50 = vsel %vm1292_vm0, %v1465_v48, 0 }
 0x347   : > { %1485 = vmatpush.bf16.msrb.mxu1 %v1470_v49  ;;  %1498 = vmatpush.bf16.msrb.mxu2 %v1473_v50 }
 0x349   : > { %2735 = vmatmul.msk.bf16.vlgmr.msra.gmra.mxu2 %vm1288_vm10, %v2734_v33 }
 0x34a   : > { %2733 = vmatmul.msk.bf16.vlgmr.msra.gmra.mxu1 %vm1288_vm10, %v1274_v20 }
 0x34b   : > { %2743 = vmatmul.msk.bf16.vlgmr.msra.gmra.mxu0 %vm1288_vm10, %v2742_v52 }
 0x34c   : > { %v1527_v53 = vpop.permute.xlu0 %1526  ;;  %v1591_v55 = vpop.permute.xlu1 %1590 }
 0x34d   : > { %v1529_v56 = vsel %vm928_vm4, %v1525_v59, %v1527_v53  ;;  %v1540_v57 = vsel %vm1292_vm0, %v1527_v53, 0  ;;  %v1593_v4 = vsel %vm3594_vm5, %v1589_v46, %v1591_v55  ;;  %v1604_v11 = vsel %vm1292_vm0, %v1591_v55, 0  ;;  %v1781_v12 = vpop.permute.xlu2 %1780 }
 0x34e   : > { %v1537_v40 = vsel %vm1292_vm0, %v1529_v56, 0  ;;  %v1601_v60 = vsel %vm1292_vm0, %v1593_v4, 0  ;;  %1575 = vmatpush.bf16.msra.mxu2 %v1540_v57 }
 0x34f   : > { %1562 = vmatpush.bf16.msra.mxu1 %v1537_v40  ;;  %1626 = vmatpush.bf16.msrb.mxu0 %v1601_v60 }
 0x353   : > { %1703 = vmatpush.bf16.msra.mxu0 %v1668_v61 }
 0x354   : > { %v1587_v63 = vpop.permute.xlu0 %1586  ;;  %v1719_v2 = vpop.permute.xlu1 %1718 }
 0x355   : > { %v1592_v3 = vsel %vm3594_vm5, %v1587_v63, %v1589_v46  ;;  %v1732_v23 = vsel %vm1292_vm0, %v1719_v2, 0  ;;  %vm3602_vm5 = vmmov %vm3601_vm13 }
 0x356   : > { %v1598_v7 = vsel %vm1292_vm0, %v1592_v3, 0 }
 0x357   : > { %1613 = vmatpush.bf16.msra.mxu3 %v1598_v7 }
 0x359   : > { %2740 = vmatmul.msk.bf16.vlgmr.msrb.gmra.mxu2 %vm1288_vm10, %v2738_v39 }
 0x35a   : > { %2739 = vmatmul.msk.bf16.vlgmr.msrb.gmra.mxu1 %vm1288_vm10, %v2738_v39  ;;  %2747 = vmatmul.msk.bf16.vlgmr.msra.gmra.mxu3 %vm1288_vm10, %v2746_v9 }
 0x35b   : > { %1639 = vmatpush.bf16.msrb.mxu1 %v1604_v11  ;;  %2748 = vmatmul.msk.bf16.vlgmr.msrb.gmra.mxu0 %vm1288_vm10, %v2746_v9 }
 0x35c   : > { %v1653_v13 = vpop.permute.xlu0 %1652  ;;  %v1779_v14 = vpop.permute.xlu1 %1778 }
 0x35d   : > { %v1656_v15 = vsel %vm1046_vm6, %v1651_v42, %v1653_v13  ;;  %v1657_v16 = vsel %vm1046_vm6, %v1653_v13, %v1655_v51  ;;  %v1784_v18 = vsel %vm1164_vm8, %v1779_v14, %v1781_v12 }
 0x35e   : > { %v1662_v19 = vsel %vm1292_vm0, %v1656_v15, 0  ;;  %v1665_v20 = vsel %vm1292_vm0, %v1657_v16, 0  ;;  %v1790_v21 = vsel %vm1292_vm0, %v1784_v18, 0 }
 0x35f   : > { %1677 = vmatpush.bf16.msrb.mxu2 %v1662_v19  ;;  %1690 = vmatpush.bf16.msrb.mxu3 %v1665_v20 }
 0x360   : > { %1805 = vmatpush.bf16.msrb.mxu0 %v1790_v21 }
 0x363   : > { %1767 = vmatpush.bf16.msra.mxu3 %v1732_v23 }
 0x364   : > { %v1717_v24 = vpop.permute.xlu0 %1716 }
 0x365   : > { %v1721_v25 = vsel %vm3601_vm13, %v1717_v24, %v1719_v2  ;;  %v1720_v22 = vsel %vm3602_vm5, %v1715_v62, %v1717_v24 }
 0x366   : > { %v1729_v28 = vsel %vm1292_vm0, %v1721_v25, 0  ;;  %v1726_v17 = vsel %vm1292_vm0, %v1720_v22, 0 }
 0x369   : > { %2745 = vmatmul.msk.bf16.vlgmr.msra.gmra.mxu2 %vm1288_vm10, %v2742_v52 }
 0x36a   : > { %1754 = vmatpush.bf16.msra.mxu2 %v1729_v28  ;;  %2744 = vmatmul.msk.bf16.vlgmr.msra.gmra.mxu1 %vm1288_vm10, %v2742_v52 }
 0x36b   : > { %2752 = vmatmul.msk.bf16.vlgmr.msrb.gmra.mxu3 %vm1288_vm10, %v2750_v27  ;;  %1741 = vmatpush.bf16.msra.mxu1 %v1726_v17 }
 0x36c   : > { %2753 = vmatmul.msk.bf16.vlgmr.msra.gmra.mxu0 %vm1288_vm10, %v2750_v27  ;;  %v1783_v29 = vpop.permute.xlu0 %1782 }
 0x36d   : > { %v1785_v30 = vsel %vm1164_vm8, %v1781_v12, %v1783_v29  ;;  %v1796_v33 = vsel %vm1292_vm0, %v1783_v29, 0 }
 0x36e   : > { %v1793_v59 = vsel %vm1292_vm0, %v1785_v30, 0 }
 0x379   : > { %2751 = vmatmul.msk.bf16.vlgmr.msrb.gmra.mxu2 %vm1288_vm10, %v2750_v27 }
 0x37a   : > { %1831 = vmatpush.bf16.msrb.mxu2 %v1796_v33  ;;  %2749 = vmatmul.msk.bf16.vlgmr.msrb.gmra.mxu1 %vm1288_vm10, %v2746_v9 }
 0x37b   : > { %2757 = vmatmul.msk.bf16.vlgmr.msra.gmra.mxu3 %vm1288_vm10, %v2754_v31  ;;  %1818 = vmatpush.bf16.msrb.mxu1 %v1793_v59 }
 0x37c   : > { %2759 = vmatmul.msk.bf16.vlgmr.msrb.gmra.mxu0 %vm1288_vm10, %v2758_v34 }
 0x389   : > { %2756 = vmatmul.msk.bf16.vlgmr.msra.gmra.mxu2 %vm1288_vm10, %v2754_v31 }
 0x38a   : > { %2755 = vmatmul.msk.bf16.vlgmr.msra.gmra.mxu1 %vm1288_vm10, %v2754_v31 }
 0x398   : > { %v1311_v6 = vpop.f32.mrf.mxu0 }
 0x399   : > { %2761 = vmatmul.msk.bf16.vlgmr.msrb.gmra.mxu2 %vm1288_vm10, %v2758_v34  ;;  %v1363_v5 = vadd.f32 %v1362_v35, %v1311_v6  ;;  %v1844_v35 = vpop.permute.xlu0 %1843 }
 0x39a   : > { %2760 = vmatmul.msk.bf16.vlgmr.msrb.gmra.mxu1 %vm1288_vm10, %v2758_v34 }
 0x3a0   : > { %v1313_v37 = vpop.f32.mrf.mxu0 }
 0x3a6   : > { %v1436_v38 = vpop.f32.mrf.mxu3 }
 0x3a8   : > { %v1375_v39 = vpop.f32.mrf.mxu0 }
 0x3ae   : > { %v1438_v54 = vpop.f32.mrf.mxu3 }
 0x3b0   : > { %v1377_v10 = vpop.f32.mrf.mxu0 }
 0x3b7   : > { %v1324_v41 = vpop.f32.mrf.mxu1 }
 0x3b8   : > { %v1376_v42 = vadd.f32 %v1375_v39, %v1324_v41  ;;  %v1449_v43 = vpop.f32.mrf.mxu0 }
 0x3ba   : > { %v1454_v32 = vadd.f32 %v1436_v38, %v1376_v42  ;;  %v1853_v38 = vpop.permute.xlu1 %1852 }
 0x3bc   : > { %v1337_v44 = vpop.f32.mrf.mxu2  ;;  %v1513_v1 = vpop.f32.mrf.mxu3 }
 0x3bf   : > { %v1326_v45 = vpop.f32.mrf.mxu1 }
 0x3c0   : > { %v1451_v46 = vpop.f32.mrf.mxu0 }
 0x3c4   : > { %v1339_v47 = vpop.f32.mrf.mxu2  ;;  %v1515_v48 = vpop.f32.mrf.mxu3 }
 0x3c7   : > { %v1388_v49 = vpop.f32.mrf.mxu1 }
 0x3c8   : > { %v1389_v50 = vadd.f32 %v1388_v49, %v1337_v44  ;;  %v1551_v51 = vpop.f32.mrf.mxu0 }
 0x3ca   : > { %v1455_v52 = vadd.f32 %v1449_v43, %v1389_v50 }
 0x3cc   : > { %v1519_v53 = vadd.f32 %v1513_v1, %v1455_v52  ;;  %v1423_v55 = vpop.f32.mrf.mxu2 }
 0x3cd   : > { %v1453_v21 = vadd.f32 %v1423_v55, %v1363_v5 }
 0x3cf   : > { %v1390_v56 = vpop.f32.mrf.mxu1 }
 0x3d0   : > { %v1553_v57 = vpop.f32.mrf.mxu0 }
 0x3d4   : > { %v1425_v4 = vpop.f32.mrf.mxu2 }
 0x3d7   : > { %v1487_v40 = vpop.f32.mrf.mxu1 }
 0x3d8   : > { %v1628_v60 = vpop.f32.mrf.mxu0  ;;  %v1517_v24 = vadd.f32 %v1487_v40, %v1453_v21 }
 0x3da   : > { %v1581_v28 = vadd.f32 %v1551_v51, %v1517_v24 }
 0x3dc   : > { %v1500_v61 = vpop.f32.mrf.mxu2 }
 0x3dd   : > { %v1615_v62 = vpop.f32.mrf.mxu3  ;;  %v1518_v36 = vadd.f32 %v1500_v61, %v1454_v32 }
 0x3de   : > { %v1645_v17 = vadd.f32 %v1615_v62, %v1581_v28 }
 0x3df   : > { %v1489_v63 = vpop.f32.mrf.mxu1 }
 0x3e0   : > { %v1630_v2 = vpop.f32.mrf.mxu0 }
 0x3e4   : > { %v1502_v3 = vpop.f32.mrf.mxu2 }
 0x3e5   : > { %v1617_v7 = vpop.f32.mrf.mxu3 }
 0x3e7   : > { %v1564_v9 = vpop.f32.mrf.mxu1 }
 0x3e8   : > { %v1582_v39 = vadd.f32 %v1564_v9, %v1518_v36 }
 0x3e9   : > { %v1705_v11 = vpop.f32.mrf.mxu0 }
 0x3ea   : > { %v1646_v41 = vadd.f32 %v1628_v60, %v1582_v39 }
 0x3ec   : > { %v1577_v12 = vpop.f32.mrf.mxu2 }
 0x3ed   : > { %v1583_v43 = vadd.f32 %v1577_v12, %v1519_v53 }
 0x3ee   : > { %v1692_v13 = vpop.f32.mrf.mxu3 }
 0x3ef   : > { %v1566_v14 = vpop.f32.mrf.mxu1  ;;  %v1710_v1 = vadd.f32 %v1692_v13, %v1646_v41 }
 0x3f1   : > { %v1707_v15 = vpop.f32.mrf.mxu0 }
 0x3f4   : > { %v1579_v16 = vpop.f32.mrf.mxu2 }
 0x3f6   : > { %v1694_v18 = vpop.f32.mrf.mxu3 }
 0x3f7   : > { %v1641_v19 = vpop.f32.mrf.mxu1  ;;  %v1896_v18 = vld [vmem:[%s3591_s9] sm:$0x1] }
 0x3f8   : > { %v1647_v46 = vadd.f32 %v1641_v19, %v1583_v43 }
 0x3f9   : > { %v1807_v20 = vpop.f32.mrf.mxu0 }
 0x3fa   : > { %v1711_v49 = vadd.f32 %v1705_v11, %v1647_v46 }
 0x3fc   : > { %v1679_v23 = vpop.f32.mrf.mxu2 }
 0x3fd   : > { %v1709_v30 = vadd.f32 %v1679_v23, %v1645_v17 }
 0x3fe   : > { %v1769_v25 = vpop.f32.mrf.mxu3 }
 0x3ff   : > { %v1643_v22 = vpop.f32.mrf.mxu1  ;;  %v1775_v51 = vadd.f32 %v1769_v25, %v1711_v49 }
 0x400   : > { %v2762_v22 = vld [vmem:[%s3591_s9 + $0x1] sm:$0x1] }
 0x401   : > { %v1809_v27 = vpop.f32.mrf.mxu0 }
 0x404   : > { %v1681_v29 = vpop.f32.mrf.mxu2 }
 0x406   : > { %v1771_v31 = vpop.f32.mrf.mxu3 }
 0x407   : > { %v1743_v33 = vpop.f32.mrf.mxu1 }
 0x408   : > { %v1773_v34 = vadd.f32 %v1743_v33, %v1709_v30 }
 0x40a   : > { %v1837_v59 = vadd.f32 %v1807_v20, %v1773_v34 }
 0x40c   : > { %v1846_v6 = vmul.f32 %v1844_v35, %v1837_v59  ;;  %v1756_v37 = vpop.f32.mrf.mxu2 }
 0x40d   : > { %v1774_v32 = vadd.f32 %v1756_v37, %v1710_v1 }
 0x40e   : > { %v1855_v5 = vadd.f32 %v1853_v38, %v1846_v6 }
 0x40f   : > { %v1745_v54 = vpop.f32.mrf.mxu1 }
 0x410   : > { %vm1858_vm5 = vcmp.ge.f32.partialorder %v1855_v5, 0.0  ;;  %v1861_v10 = vmul.f32 0.01, %v1855_v5 }
 0x412   : > { %v1864_v42 = vsel %vm1858_vm5, %v1855_v5, %v1861_v10  ;;  %v2769_v10 = vld [vmem:[%s3591_s9 + $0x2] sm:$0x1] }
 0x413   : > { %v1867_v44 = vsel %vm3288_vm7, %v1864_v42, 0.0 }
 0x414   : > { %v1758_v45 = vpop.f32.mrf.mxu2  ;;  %1876 = vrot.lane.b32.xlu2 %v1867_v44, %s2879_s29 }
 0x417   : > { %v1820_v47 = vpop.f32.mrf.mxu1 }
 0x418   : > { %v1838_v48 = vadd.f32 %v1820_v47, %v1774_v32 }
 0x41a   : > { %v1847_v50 = vmul.f32 %v1844_v35, %v1838_v48 }
 0x41c   : > { %v1856_v52 = vadd.f32 %v1853_v38, %v1847_v50  ;;  %v1833_v55 = vpop.f32.mrf.mxu2 }
 0x41d   : > { %v1839_v56 = vadd.f32 %v1833_v55, %v1775_v51 }
 0x41e   : > { %vm1859_vm13 = vcmp.ge.f32.partialorder %v1856_v52, 0.0  ;;  %v1862_v57 = vmul.f32 0.01, %v1856_v52 }
 0x41f   : > { %v1848_v53 = vmul.f32 %v1844_v35, %v1839_v56  ;;  %v1822_v4 = vpop.f32.mrf.mxu1  ;;  %v2773_v56 = vld [vmem:[%s3591_s9 + $0x3] sm:$0x1] }
 0x420   : > { %v1865_v26 = vsel %vm1859_vm13, %v1856_v52, %v1862_v57 }
 0x421   : > { %v1857_v40 = vadd.f32 %v1853_v38, %v1848_v53  ;;  %v1868_v60 = vsel %vm3278_vm12, %v1865_v26, 0.0 }
 0x422   : > { %1878 = vrot.lane.b32.xlu0 %v1868_v60, %s2879_s29 }
 0x423   : > { %vm1860_vm7 = vcmp.ge.f32.partialorder %v1857_v40, 0.0  ;;  %v1863_v61 = vmul.f32 0.01, %v1857_v40 }
 0x424   : > { %v1835_v62 = vpop.f32.mrf.mxu2 }
 0x425   : > { %v1866_v63 = vsel %vm1860_vm7, %v1857_v40, %v1863_v61  ;;  %vm2522_vm7 = vcmask 1040384  }
 0x426   : > { %v1869_v2 = vsel %vm3295_vm11, %v1866_v63, 0.0  ;;  %v2777_v63 = vld [vmem:[%s3591_s9 + $0x4] sm:$0x1] }
 0x427   : > { %1880 = vrot.lane.b32.xlu1 %v1869_v2, %s2879_s29 }
 0x46e   : > { %v1877_v3 = vpop.permute.xlu2 %1876 }
 0x46f   : > { %1887 = vst.msk [vmem:[#allocation4] sm:$0xff] %vm1263_vm15, %v1877_v3 }
 0x476   : > { %v1890_v7 = vld [vmem:[#allocation4] sm:$0xff] }
 0x477   : > { %v1893_v9 = vpack.c.bf16 %v1890_v7, %v1890_v7 }
 0x479   : > { %1902 = vrot.lane.b32.xlu2 %v1893_v9, %s2870_s17  ;;  %v1965_v8 = vsel %vm1292_vm0, %v1893_v9, 0 }
 0x47a   : > { %1980 = vmatpush.bf16.msra.mxu2 %v1965_v8 }
 0x47d   : > { %2766 = vmatmul.msk.bf16.vlgmr.msra.gmra.mxu2 %vm1288_vm10, %v1896_v18 }
 0x481   : > { %2014 = vrot.lane.b32.xlu2 %v1893_v9, %s2871_s20 }
 0x489   : > { %2078 = vrot.lane.b32.xlu2 %v1893_v9, %s2872_s21 }
 0x491   : > { %2142 = vrot.lane.b32.xlu2 %v1893_v9, %s2873_s22 }
 0x494   : > { %v1879_v58 = vpop.permute.xlu0 %1878 }
 0x495   : > { %v1882_v11 = vsel %vm1257_vm14, %v1877_v3, %v1879_v58 }
 0x496   : > { %v1894_v12 = vpack.c.bf16 %v1882_v11, %v1882_v11  ;;  %v2781_v11 = vld [vmem:[%s3591_s9 + $0x5] sm:$0x1] }
 0x498   : > { %1904 = vrot.lane.b32.xlu0 %v1894_v12, %s2870_s17  ;;  %v1968_v25 = vsel %vm1292_vm0, %v1894_v12, 0 }
 0x499   : > { %v1881_v13 = vpop.permute.xlu1 %1880  ;;  %2206 = vrot.lane.b32.xlu2 %v1893_v9, %s2875_s24 }
 0x49a   : > { %v1883_v14 = vsel %vm1257_vm14, %v1879_v58, %v1881_v13 }
 0x49b   : > { %1889 = vst.msk [vmem:[#allocation4 + $0x10] sm:$0xff] %vm1266_vm9, %v1883_v14 }
 0x4a0   : > { %2016 = vrot.lane.b32.xlu0 %v1894_v12, %s2871_s20 }
 0x4a1   : > { %2270 = vrot.lane.b32.xlu2 %v1893_v9, %s2874_s23 }
 0x4a2   : > { %v1892_v15 = vld [vmem:[#allocation4 + $0x10] sm:$0xff] }
 0x4a3   : > { %v1895_v16 = vpack.c.bf16 %v1892_v15, %v1892_v15 }
 0x4a5   : > { %1906 = vrot.lane.b32.xlu1 %v1895_v16, %s2870_s17  ;;  %v1971_v59 = vsel %vm1292_vm0, %v1895_v16, 0  ;;  %s2828_s17 = smul.u32 3, %s3610_s14 }
 0x4a7   : > { %s357_s14 = scalar_lea.vmem %s3592_s10, %s2828_s17 }
 0x4a8   : > { %2080 = vrot.lane.b32.xlu0 %v1894_v12, %s2872_s21 }
 0x4a9   : > { %2334 = vrot.lane.b32.xlu2 %v1893_v9, %s2876_s25 }
 0x4ad   : > { %2018 = vrot.lane.b32.xlu1 %v1895_v16, %s2871_s20 }
 0x4b0   : > { %2144 = vrot.lane.b32.xlu0 %v1894_v12, %s2873_s22 }
 0x4b1   : > { %2398 = vrot.lane.b32.xlu2 %v1893_v9, %s2877_s26 }
 0x4b5   : > { %2082 = vrot.lane.b32.xlu1 %v1895_v16, %s2872_s21 }
 0x4b8   : > { %2208 = vrot.lane.b32.xlu0 %v1894_v12, %s2875_s24 }
 0x4bd   : > { %2146 = vrot.lane.b32.xlu1 %v1895_v16, %s2873_s22 }
 0x4c0   : > { %2272 = vrot.lane.b32.xlu0 %v1894_v12, %s2874_s23 }
 0x4c5   : > { %2210 = vrot.lane.b32.xlu1 %v1895_v16, %s2875_s24 }
 0x4c8   : > { %2336 = vrot.lane.b32.xlu0 %v1894_v12, %s2876_s25 }
 0x4cd   : > { %2274 = vrot.lane.b32.xlu1 %v1895_v16, %s2874_s23 }
 0x4d0   : > { %2400 = vrot.lane.b32.xlu0 %v1894_v12, %s2877_s26 }
 0x4d3   : > { %v1903_v19 = vpop.permute.xlu2 %1902 }
 0x4d5   : > { %2338 = vrot.lane.b32.xlu1 %v1895_v16, %s2876_s25 }
 0x4db   : > { %v2015_v23 = vpop.permute.xlu2 %2014 }
 0x4dd   : > { %2402 = vrot.lane.b32.xlu1 %v1895_v16, %s2877_s26 }
 0x4e3   : > { %v2079_v28 = vpop.permute.xlu2 %2078 }
 0x4eb   : > { %v2143_v38 = vpop.permute.xlu2 %2142 }
 0x4f3   : > { %v2207_v32 = vpop.permute.xlu2 %2206 }
 0x4fb   : > { %v2271_v4 = vpop.permute.xlu2 %2270 }
 0x503   : > { %v2335_v58 = vpop.permute.xlu2 %2334 }
 0x50a   : > { %v1905_v20 = vpop.permute.xlu0 %1904 }
 0x50b   : > { %v1908_v21 = vsel %vm711_vm2, %v1903_v19, %v1905_v20 }
 0x50c   : > { %v1914_v24 = vsel %vm1292_vm0, %v1908_v21, 0 }
 0x50d   : > { %1929 = vmatpush.bf16.msrb.mxu3 %v1914_v24  ;;  %v2785_v24 = vld [vmem:[%s3591_s9 + $0x6] sm:$0x1] }
 0x510   : > { %2763 = vmatmul.msk.bf16.vlgmr.msrb.gmra.mxu3 %vm1288_vm10, %v2762_v22 }
 0x511   : > { %1993 = vmatpush.bf16.msra.mxu3 %v1968_v25 }
 0x512   : > { %v2017_v27 = vpop.permute.xlu0 %2016 }
 0x513   : > { %v2020_v17 = vsel %vm810_vm1, %v2015_v23, %v2017_v27 }
 0x514   : > { %v2026_v34 = vsel %vm1292_vm0, %v2020_v17, 0  ;;  %v2789_v17 = vld [vmem:[%s3591_s9 + $0x7] sm:$0x1] }
 0x517   : > { %v1907_v29 = vpop.permute.xlu1 %1906 }
 0x518   : > { %v1909_v30 = vsel %vm711_vm2, %v1905_v20, %v1907_v29  ;;  %v1920_v31 = vsel %vm1292_vm0, %v1907_v29, 0  ;;  %v2793_v29 = vld [vmem:[%s3591_s9 + $0x8] sm:$0x1] }
 0x519   : > { %v1917_v33 = vsel %vm1292_vm0, %v1909_v30, 0  ;;  %1955 = vmatpush.bf16.msra.mxu1 %v1920_v31  ;;  %v1982_v30 = vpop.f32.mrf.mxu2 }
 0x51a   : > { %1942 = vmatpush.bf16.msra.mxu0 %v1917_v33  ;;  %v2081_v35 = vpop.permute.xlu0 %2080 }
 0x51b   : > { %v2084_v36 = vsel %vm869_vm3, %v2079_v28, %v2081_v35 }
 0x51c   : > { %2765 = vmatmul.msk.bf16.vlgmr.msra.gmra.mxu1 %vm1288_vm10, %v2762_v22  ;;  %v2090_v6 = vsel %vm1292_vm0, %v2084_v36, 0 }
 0x51d   : > { %2041 = vmatpush.bf16.msrb.mxu1 %v2026_v34  ;;  %2764 = vmatmul.msk.bf16.vlgmr.msra.gmra.mxu0 %vm1288_vm10, %v2762_v22 }
 0x51e   : > { %2006 = vmatpush.bf16.msrb.mxu0 %v1971_v59 }
 0x51f   : > { %v2019_v37 = vpop.permute.xlu1 %2018 }
 0x520   : > { %v2021_v39 = vsel %vm810_vm1, %v2017_v27, %v2019_v37  ;;  %v2032_v5 = vsel %vm1292_vm0, %v2019_v37, 0  ;;  %2767 = vmatmul.msk.bf16.vlgmr.msra.gmra.mxu3 %vm1288_vm10, %v1896_v18  ;;  %vm3603_vm1 = vcmask 883712  }
 0x521   : > { %v2029_v54 = vsel %vm1292_vm0, %v2021_v39, 0  ;;  %2067 = vmatpush.bf16.msrb.mxu3 %v2032_v5  ;;  %vm3604_vm2 = vmmov %vm3603_vm1  ;;  %v1984_v31 = vpop.f32.mrf.mxu2 }
 0x522   : > { %2105 = vmatpush.bf16.msra.mxu0 %v2090_v6  ;;  %2054 = vmatpush.bf16.msrb.mxu2 %v2029_v54  ;;  %v2145_v41 = vpop.permute.xlu0 %2144 }
 0x523   : > { %v2148_v42 = vsel %vm928_vm4, %v2143_v38, %v2145_v41 }
 0x524   : > { %v2154_v43 = vsel %vm1292_vm0, %v2148_v42, 0 }
 0x525   : > { %2771 = vmatmul.msk.bf16.vlgmr.msrb.gmra.mxu2 %vm1288_vm10, %v2769_v10  ;;  %2169 = vmatpush.bf16.msra.mxu3 %v2154_v43 }
 0x527   : > { %v2083_v44 = vpop.permute.xlu1 %2082 }
 0x528   : > { %v2085_v1 = vsel %vm869_vm3, %v2081_v35, %v2083_v44  ;;  %v2096_v45 = vsel %vm1292_vm0, %v2083_v44, 0  ;;  %vm3605_vm3 = vcmask 744448  }
 0x529   : > { %v2093_v46 = vsel %vm1292_vm0, %v2085_v1, 0  ;;  %2131 = vmatpush.bf16.msra.mxu2 %v2096_v45 }
 0x52a   : > { %2118 = vmatpush.bf16.msra.mxu1 %v2093_v46  ;;  %v2209_v47 = vpop.permute.xlu0 %2208 }
 0x52b   : > { %v2212_v48 = vsel %vm3603_vm1, %v2207_v32, %v2209_v47 }
 0x52c   : > { %2770 = vmatmul.msk.bf16.vlgmr.msrb.gmra.mxu1 %vm1288_vm10, %v2769_v10  ;;  %v2218_v49 = vsel %vm1292_vm0, %v2212_v48, 0 }
 0x52d   : > { %2768 = vmatmul.msk.bf16.vlgmr.msrb.gmra.mxu0 %vm1288_vm10, %v1896_v18  ;;  %2233 = vmatpush.bf16.msrb.mxu2 %v2218_v49  ;;  %v2399_v18 = vpop.permute.xlu2 %2398 }
 0x52f   : > { %v2147_v50 = vpop.permute.xlu1 %2146 }
 0x530   : > { %v2149_v51 = vsel %vm928_vm4, %v2145_v41, %v2147_v50  ;;  %v2160_v52 = vsel %vm1292_vm0, %v2147_v50, 0  ;;  %2772 = vmatmul.msk.bf16.vlgmr.msrb.gmra.mxu3 %vm1288_vm10, %v2769_v10  ;;  %vm3606_vm4 = vmmov %vm3605_vm3 }
 0x531   : > { %v2157_v55 = vsel %vm1292_vm0, %v2149_v51, 0  ;;  %2195 = vmatpush.bf16.msrb.mxu1 %v2160_v52 }
 0x532   : > { %2182 = vmatpush.bf16.msrb.mxu0 %v2157_v55  ;;  %v2273_v57 = vpop.permute.xlu0 %2272 }
 0x533   : > { %v2276_v60 = vsel %vm1046_vm6, %v2271_v4, %v2273_v57 }
 0x534   : > { %v2282_v61 = vsel %vm1292_vm0, %v2276_v60, 0 }
 0x535   : > { %2776 = vmatmul.msk.bf16.vlgmr.msra.gmra.mxu2 %vm1288_vm10, %v2773_v56 }
 0x537   : > { %v2211_v53 = vpop.permute.xlu1 %2210 }
 0x538   : > { %v2213_v26 = vsel %vm3604_vm2, %v2209_v47, %v2211_v53  ;;  %v2224_v62 = vsel %vm1292_vm0, %v2211_v53, 0  ;;  %vm2524_vm2 = vcmask 1041408  }
 0x539   : > { %v2221_v40 = vsel %vm1292_vm0, %v2213_v26, 0 }
 0x53a   : > { %2246 = vmatpush.bf16.msrb.mxu3 %v2221_v40  ;;  %v2337_v9 = vpop.permute.xlu0 %2336 }
 0x53b   : > { %v2340_v15 = vsel %vm3606_vm4, %v2335_v58, %v2337_v9 }
 0x53c   : > { %2775 = vmatmul.msk.bf16.vlgmr.msra.gmra.mxu1 %vm1288_vm10, %v2773_v56  ;;  %v2346_v20 = vsel %vm1292_vm0, %v2340_v15, 0 }
 0x53d   : > { %2774 = vmatmul.msk.bf16.vlgmr.msra.gmra.mxu0 %vm1288_vm10, %v2773_v56  ;;  %2297 = vmatpush.bf16.msra.mxu1 %v2282_v61 }
 0x53e   : > { %2259 = vmatpush.bf16.msra.mxu0 %v2224_v62 }
 0x53f   : > { %v2275_v2 = vpop.permute.xlu1 %2274 }
 0x540   : > { %v2277_v3 = vsel %vm1046_vm6, %v2273_v57, %v2275_v2  ;;  %v2288_v7 = vsel %vm1292_vm0, %v2275_v2, 0  ;;  %2778 = vmatmul.msk.bf16.vlgmr.msra.gmra.mxu3 %vm1288_vm10, %v2777_v63 }
 0x541   : > { %v2285_v8 = vsel %vm1292_vm0, %v2277_v3, 0  ;;  %2323 = vmatpush.bf16.msra.mxu3 %v2288_v7 }
 0x542   : > { %2310 = vmatpush.bf16.msra.mxu2 %v2285_v8  ;;  %v2401_v16 = vpop.permute.xlu0 %2400 }
 0x543   : > { %v2404_v21 = vsel %vm1164_vm8, %v2399_v18, %v2401_v16 }
 0x544   : > { %v2410_v23 = vsel %vm1292_vm0, %v2404_v21, 0 }
 0x545   : > { %2782 = vmatmul.msk.bf16.vlgmr.msrb.gmra.mxu2 %vm1288_vm10, %v2781_v11 }
 0x547   : > { %v2339_v12 = vpop.permute.xlu1 %2338 }
 0x548   : > { %v2352_v13 = vsel %vm1292_vm0, %v2339_v12, 0  ;;  %v2341_v14 = vsel %vm3605_vm3, %v2337_v9, %v2339_v12  ;;  %vm2529_vm3 = vcmp.lt.s32.totalorder %v359_v0, 288 }
 0x549   : > { %2387 = vmatpush.bf16.msrb.mxu2 %v2352_v13  ;;  %v2349_v19 = vsel %vm1292_vm0, %v2341_v14, 0 }
 0x54c   : > { %2780 = vmatmul.msk.bf16.vlgmr.msrb.gmra.mxu1 %vm1288_vm10, %v2777_v63 }
 0x54d   : > { %2374 = vmatpush.bf16.msrb.mxu1 %v2349_v19  ;;  %2779 = vmatmul.msk.bf16.vlgmr.msrb.gmra.mxu0 %vm1288_vm10, %v2777_v63 }
 0x54e   : > { %2361 = vmatpush.bf16.msrb.mxu0 %v2346_v20 }
 0x54f   : > { %v2403_v25 = vpop.permute.xlu1 %2402 }
 0x550   : > { %2783 = vmatmul.msk.bf16.vlgmr.msrb.gmra.mxu3 %vm1288_vm10, %v2781_v11  ;;  %v2405_v22 = vsel %vm1164_vm8, %v2401_v16, %v2403_v25  ;;  %v2416_v27 = vsel %vm1292_vm0, %v2403_v25, 0 }
 0x551   : > { %2425 = vmatpush.bf16.msrb.mxu3 %v2410_v23  ;;  %v2413_v28 = vsel %vm1292_vm0, %v2405_v22, 0 }
 0x555   : > { %2787 = vmatmul.msk.bf16.vlgmr.msra.gmra.mxu2 %vm1288_vm10, %v2785_v24 }
 0x55c   : > { %2786 = vmatmul.msk.bf16.vlgmr.msra.gmra.mxu1 %vm1288_vm10, %v2785_v24 }
 0x55d   : > { %2451 = vmatpush.bf16.msra.mxu1 %v2416_v27  ;;  %2784 = vmatmul.msk.bf16.vlgmr.msra.gmra.mxu0 %vm1288_vm10, %v2781_v11 }
 0x55e   : > { %2438 = vmatpush.bf16.msra.mxu0 %v2413_v28 }
 0x560   : > { %2788 = vmatmul.msk.bf16.vlgmr.msra.gmra.mxu3 %vm1288_vm10, %v2785_v24 }
 0x565   : > { %2792 = vmatmul.msk.bf16.vlgmr.msrb.gmra.mxu2 %vm1288_vm10, %v2789_v17 }
 0x56c   : > { %2791 = vmatmul.msk.bf16.vlgmr.msrb.gmra.mxu1 %vm1288_vm10, %v2789_v17 }
 0x56d   : > { %2790 = vmatmul.msk.bf16.vlgmr.msrb.gmra.mxu0 %vm1288_vm10, %v2789_v17 }
 0x570   : > { %2794 = vmatmul.msk.bf16.vlgmr.msrb.gmra.mxu3 %vm1288_vm10, %v2793_v29 }
 0x57c   : > { %2796 = vmatmul.msk.bf16.vlgmr.msra.gmra.mxu1 %vm1288_vm10, %v2793_v29 }
 0x57d   : > { %2795 = vmatmul.msk.bf16.vlgmr.msra.gmra.mxu0 %vm1288_vm10, %v2793_v29 }
 0x593   : > { %v1931_v33 = vpop.f32.mrf.mxu3 }
 0x594   : > { %v1983_v34 = vadd.f32 %v1982_v30, %v1931_v33 }
 0x599   : > { %v1957_v59 = vpop.f32.mrf.mxu1 }
 0x59a   : > { %v1944_v35 = vpop.f32.mrf.mxu0 }
 0x59b   : > { %v1933_v36 = vpop.f32.mrf.mxu3 }
 0x5a1   : > { %v1959_v6 = vpop.f32.mrf.mxu1 }
 0x5a2   : > { %v1946_v37 = vpop.f32.mrf.mxu0 }
 0x5a3   : > { %v1995_v38 = vpop.f32.mrf.mxu3 }
 0x5a4   : > { %v1996_v39 = vadd.f32 %v1995_v38, %v1944_v35 }
 0x5a8   : > { %v2056_v5 = vpop.f32.mrf.mxu2 }
 0x5a9   : > { %v2043_v54 = vpop.f32.mrf.mxu1  ;;  %v2074_v10 = vadd.f32 %v2056_v5, %v1996_v39 }
 0x5aa   : > { %v2073_v41 = vadd.f32 %v2043_v54, %v1983_v34  ;;  %v2008_v42 = vpop.f32.mrf.mxu0 }
 0x5ab   : > { %v2009_v43 = vadd.f32 %v2008_v42, %v1957_v59  ;;  %v1997_v44 = vpop.f32.mrf.mxu3 }
 0x5b0   : > { %v2058_v1 = vpop.f32.mrf.mxu2 }
 0x5b1   : > { %v2045_v45 = vpop.f32.mrf.mxu1 }
 0x5b2   : > { %v2010_v46 = vpop.f32.mrf.mxu0 }
 0x5b3   : > { %v2069_v32 = vpop.f32.mrf.mxu3 }
 0x5b4   : > { %v2075_v19 = vadd.f32 %v2069_v32, %v2009_v43 }
 0x5b8   : > { %v2133_v47 = vpop.f32.mrf.mxu2 }
 0x5b9   : > { %v2120_v48 = vpop.f32.mrf.mxu1  ;;  %v2139_v21 = vadd.f32 %v2133_v47, %v2075_v19 }
 0x5ba   : > { %v2107_v49 = vpop.f32.mrf.mxu0  ;;  %v2138_v25 = vadd.f32 %v2120_v48, %v2074_v10 }
 0x5bb   : > { %v2071_v50 = vpop.f32.mrf.mxu3  ;;  %v2137_v14 = vadd.f32 %v2107_v49, %v2073_v41 }
 0x5c0   : > { %v2135_v51 = vpop.f32.mrf.mxu2 }
 0x5c1   : > { %v2122_v52 = vpop.f32.mrf.mxu1 }
 0x5c2   : > { %v2109_v55 = vpop.f32.mrf.mxu0 }
 0x5c3   : > { %v2171_v56 = vpop.f32.mrf.mxu3 }
 0x5c4   : > { %v2201_v18 = vadd.f32 %v2171_v56, %v2137_v14 }
 0x5c8   : > { %v2235_v57 = vpop.f32.mrf.mxu2 }
 0x5c9   : > { %v2197_v53 = vpop.f32.mrf.mxu1  ;;  %v2265_v20 = vadd.f32 %v2235_v57, %v2201_v18 }
 0x5ca   : > { %v2184_v4 = vpop.f32.mrf.mxu0  ;;  %v2203_v27 = vadd.f32 %v2197_v53, %v2139_v21 }
 0x5cb   : > { %v2173_v26 = vpop.f32.mrf.mxu3  ;;  %v2202_v29 = vadd.f32 %v2184_v4, %v2138_v25 }
 0x5d0   : > { %v2237_v40 = vpop.f32.mrf.mxu2 }
 0x5d1   : > { %v2199_v60 = vpop.f32.mrf.mxu1 }
 0x5d2   : > { %v2186_v61 = vpop.f32.mrf.mxu0 }
 0x5d3   : > { %v2248_v62 = vpop.f32.mrf.mxu3 }
 0x5d4   : > { %v2266_v34 = vadd.f32 %v2248_v62, %v2202_v29 }
 0x5d8   : > { %v2312_v63 = vpop.f32.mrf.mxu2 }
 0x5d9   : > { %v2299_v2 = vpop.f32.mrf.mxu1  ;;  %v2330_v36 = vadd.f32 %v2312_v63, %v2266_v34 }
 0x5da   : > { %v2261_v3 = vpop.f32.mrf.mxu0  ;;  %v2329_v23 = vadd.f32 %v2299_v2, %v2265_v20 }
 0x5db   : > { %v2250_v7 = vpop.f32.mrf.mxu3  ;;  %v2267_v31 = vadd.f32 %v2261_v3, %v2203_v27 }
 0x5e0   : > { %v2314_v9 = vpop.f32.mrf.mxu2 }
 0x5e1   : > { %v2301_v8 = vpop.f32.mrf.mxu1 }
 0x5e2   : > { %v2263_v58 = vpop.f32.mrf.mxu0 }
 0x5e3   : > { %v2325_v11 = vpop.f32.mrf.mxu3 }
 0x5e4   : > { %v2331_v59 = vadd.f32 %v2325_v11, %v2267_v31 }
 0x5e8   : > { %v2389_v12 = vpop.f32.mrf.mxu2 }
 0x5e9   : > { %v2376_v13 = vpop.f32.mrf.mxu1  ;;  %v2395_v6 = vadd.f32 %v2389_v12, %v2331_v59 }
 0x5ea   : > { %v2363_v15 = vpop.f32.mrf.mxu0  ;;  %v2394_v37 = vadd.f32 %v2376_v13, %v2330_v36 }
 0x5eb   : > { %v2327_v16 = vpop.f32.mrf.mxu3  ;;  %v2393_v28 = vadd.f32 %v2363_v15, %v2329_v23 }
 0x5f0   : > { %v2391_v24 = vpop.f32.mrf.mxu2 }
 0x5f1   : > { %v2378_v22 = vpop.f32.mrf.mxu1 }
 0x5f2   : > { %v2365_v17 = vpop.f32.mrf.mxu0 }
 0x5f3   : > { %v2427_v30 = vpop.f32.mrf.mxu3 }
 0x5f4   : > { %v2457_v33 = vadd.f32 %v2427_v30, %v2393_v28 }
 0x5f6   : > { %v2797_v35 = vmul.f32 -1.442695, %v2457_v33 }
 0x5f8   : > { %2850 = vpow2.f32 %v2797_v35 }
 0x5f9   : > { %v2453_v38 = vpop.f32.mrf.mxu1 }
 0x5fa   : > { %v2459_v39 = vadd.f32 %v2453_v38, %v2395_v6  ;;  %v2440_v5 = vpop.f32.mrf.mxu0 }
 0x5fb   : > { %v2458_v54 = vadd.f32 %v2440_v5, %v2394_v37  ;;  %v2429_v10 = vpop.f32.mrf.mxu3 }
 0x5fc   : > { %v2799_v41 = vmul.f32 -1.442695, %v2459_v39 }
 0x5fd   : > { %v2798_v42 = vmul.f32 -1.442695, %v2458_v54 }
 0x5fe   : > { %v2851_v43 = vpop.eup %2850  ;;  %2852 = vpow2.f32 %v2799_v41 }
 0x5ff   : > { %2854 = vpow2.f32 %v2798_v42  ;;  %v2469_v44 = vadd.f32 1.0, %v2851_v43 }
 0x601   : > { %2856 = vrcp.f32 %v2469_v44  ;;  %v2455_v1 = vpop.f32.mrf.mxu1  ;;  %vm2477_vm6 = vweird.f32 %v2469_v44  ;;  %v2483_v8 = vand.u32 2147483648, %v2469_v44  ;;  %v2481_v12 = vand.u32 2147483647, %v2469_v44 }
 0x602   : > { %v2442_v45 = vpop.f32.mrf.mxu0 }
 0x603   : > { %v2484_v20 = vor.u32 1.1754944e-38, %v2483_v8  ;;  %vm2482_vm1 = vcmp.eq.f32.partialorder %v2481_v12, 8.507059e+37 }
 0x604   : > { %v2853_v46 = vpop.eup %2852 }
 0x605   : > { %v2855_v32 = vpop.eup %2854  ;;  %v2471_v47 = vadd.f32 1.0, %v2853_v46 }
 0x606   : > { %v2470_v48 = vadd.f32 1.0, %v2855_v32 }
 0x607   : > { %v2857_v49 = vpop.eup %2856  ;;  %2858 = vrcp.f32 %v2471_v47  ;;  %v2513_v26 = vand.u32 2147483648, %v2471_v47  ;;  %v2511_v61 = vand.u32 2147483647, %v2471_v47  ;;  %vm2507_vm14 = vweird.f32 %v2471_v47 }
 0x608   : > { %2860 = vrcp.f32 %v2470_v48  ;;  %v2473_v50 = vmul.f32 %v2857_v49, %v2469_v44  ;;  %vm2478_vm8 = vweird.f32 %v2857_v49  ;;  %v2498_v62 = vand.u32 2147483648, %v2470_v48 }
 0x609   : > { %v2496_v2 = vand.u32 2147483647, %v2470_v48  ;;  %vm3567_vm15 = vmor %vm2477_vm6, %vm2478_vm8  ;;  %v2514_v58 = vor.u32 1.1754944e-38, %v2513_v26  ;;  %vm2492_vm9 = vweird.f32 %v2470_v48  ;;  %vm2512_vm10 = vcmp.eq.f32.partialorder %v2511_v61, 8.507059e+37 }
 0x60a   : > { %v2474_v51 = vsub.f32 1.0, %v2473_v50  ;;  %v2499_v14 = vor.u32 1.1754944e-38, %v2498_v62 }
 0x60b   : > { %vm2497_vm13 = vcmp.eq.f32.partialorder %v2496_v2, 8.507059e+37 }
 0x60c   : > { %v2475_v53 = vmul.f32 %v2857_v49, %v2474_v51 }
 0x60d   : > { %v2859_v52 = vpop.eup %2858 }
 0x60e   : > { %v2861_v55 = vpop.eup %2860  ;;  %v2503_v56 = vmul.f32 %v2859_v52, %v2471_v47  ;;  %vm2508_vm12 = vweird.f32 %v2859_v52  ;;  %v2476_v3 = vadd.f32 %v2857_v49, %v2475_v53 }
 0x60f   : > { %v2488_v57 = vmul.f32 %v2861_v55, %v2470_v48  ;;  %vm2493_vm11 = vweird.f32 %v2861_v55  ;;  %vm2509_vm0 = vmor %vm2507_vm14, %vm2508_vm12 }
 0x610   : > { %v2504_v4 = vsub.f32 1.0, %v2503_v56  ;;  %vm2494_vm5 = vmor %vm2492_vm9, %vm2493_vm11  ;;  %v2480_v18 = vsel %vm3567_vm15, %v2857_v49, %v2476_v3 }
 0x611   : > { %v2489_v40 = vsub.f32 1.0, %v2488_v57  ;;  %v2485_v24 = vsel %vm2482_vm1, %v2484_v20, %v2480_v18 }
 0x612   : > { %v2505_v60 = vmul.f32 %v2859_v52, %v2504_v4 }
 0x613   : > { %v2490_v63 = vmul.f32 %v2861_v55, %v2489_v40 }
 0x614   : > { %v2506_v7 = vadd.f32 %v2859_v52, %v2505_v60 }
 0x615   : > { %v2491_v11 = vadd.f32 %v2861_v55, %v2490_v63 }
 0x616   : > { %v2510_v13 = vsel %vm2509_vm0, %v2859_v52, %v2506_v7 }
 0x617   : > { %v2515_v15 = vsel %vm2512_vm10, %v2514_v58, %v2510_v13  ;;  %v2495_v16 = vsel %vm2494_vm5, %v2861_v55, %v2491_v11 }
 0x618   : > { %v2500_v19 = vsel %vm2497_vm13, %v2499_v14, %v2495_v16  ;;  %v2521_v23 = vrot.slane %v2515_v15, 6 }
 0x619   : > { %v2520_v21 = vrot.slane %v2500_v19, 7 }
 0x61b   : > { %v2523_v25 = vsel %vm2522_vm7, %v2485_v24, %v2520_v21 }
 0x61c   : > { %v2525_v22 = vsel %vm2524_vm2, %v2523_v25, %v2521_v23 }
 0x61d   : > { %2531 = vst.msk [vmem:[%s357_s14] sm:$0x7] %vm2529_vm3, %v2525_v22 }
 0x61e PF: > { %s20_s13 = sadd.s32 1, %s2868_s13  }
 0x61f   : > { %p17_p4 = scmp.ge.s32.totalorder %s20_s13, 4  }
 0x621   :  { %19 = sbr.rel (!%p17_p4) target bundleno = 1 (0x1), region = 114 }

</bundles_post_ra>
